<compile_context>
chip_gen: v7x
topology: tpu7x:2x2x1
jax: 0.10.0
libtpu: 0.0.40
codegen_flags: <defaults>
</compile_context>

<pallas_src>
import functools

import jax
import jax.numpy as jnp
from jax.experimental import pallas as pl
from jax.experimental.pallas import tpu as pltpu


def _round_up(x, m):
    return (x + m - 1) // m * m


def _vmem_limit_bytes():
    """Physical VMEM minus ~24 MiB headroom for Mosaic internal scratch,
    spill space and the double-buffered in/out blocks."""
    try:
        cap = int(pltpu.get_tpu_info().vmem_capacity_bytes)
    except Exception:
        cap = 64 * 1024 * 1024            # conservative (v7x per-TC)
    return max(32 * 1024 * 1024, cap - 24 * 1024 * 1024)


def _pick_row_tile(*, out_h, out_w, w2, hid, c_in, h, stride, n, vmem_limit,
                   max_row_tile=None):
    """Largest output-row tile whose expanded-activation scratch and depthwise
    accumulator stay within budget.  No divisor constraint (ragged last tile)."""
    # Residents besides the scratch: double-buffered full-image input block
    # (upper bound on padded rows), weights (small), double-buffered output
    # tile; leave an 8 MiB margin for Mosaic internal scratch.
    input_block = 2 * (2 * h + 6) * w2 * c_in * 4
    scratch_budget = max(2 << 20, vmem_limit - input_block - (8 << 20))
    rows_scratch = max(1, ((scratch_budget // (w2 * hid * 4)) - 3) // stride + 1)
    # Keep the f32 depthwise accumulator around <=32 vregs (128 KiB) so the
    # 9-tap accumulate does not spill.
    # TODO(synk): for very large hid*out_w, chunk the tap accumulation over
    # out_w with lax.fori_loop instead of shrinking the row tile further.
    rows_acc = max(1, (128 * 1024) // (out_w * hid * 4))
    tr = max(1, min(out_h, rows_scratch, rows_acc))
    if max_row_tile is not None:
        tr = max(1, min(tr, max_row_tile))
    if n == 1 and out_h >= 2:
        # Single image: give megacore / the pipeline at least two row tiles.
        tr = min(tr, pl.cdiv(out_h, 2))
    return tr


# ---------------------------------------------------------------------------
# Fused kernel: 1x1 expand + BN + ReLU6  ->  3x3 dw + BN + ReLU6  ->
#               1x1 project + BN (+ residual)
# ---------------------------------------------------------------------------

def _fused_ir_kernel(*refs, has_expand, has_shortcut, stride, tr_out, out_w,
                     span, w2, height, width):
    if has_expand:
        (x_ref, we_ref, be_ref, wd_ref, bd_ref, wp_ref, bp_ref,
         o_ref, e_ref) = refs
    else:
        (x_ref, wd_ref, bd_ref, wp_ref, bp_ref, o_ref, e_ref) = refs

    t = pl.program_id(1)
    row0 = t * (tr_out * stride)            # first padded input row of this tile
    start = pl.multiple_of(row0 * w2, 8)    # w2 % 8 == 0 by construction

    # ---- 1x1 expand conv (bf16 MXU, f32 acc) + folded-BN bias + ReLU6 ----
    x2 = x_ref[0, pl.ds(start, span * w2), :]            # (span*w2, c_in) f32
    if has_expand:
        h2 = jnp.dot(x2.astype(jnp.bfloat16), we_ref[...],
                     preferred_element_type=jnp.float32)
        h2 = jnp.clip(h2 + be_ref[...], 0.0, 6.0)
    else:
        h2 = x2
    hid = h2.shape[-1]
    h3 = h2.reshape(span, w2, hid)

    # Zero the depthwise-conv padding halo (and width-alignment pad columns):
    # the PyTorch depthwise conv pads the *expanded* activations with zeros.
    rows = jax.lax.broadcasted_iota(jnp.int32, (span, w2, 1), 0) + row0
    cols = jax.lax.broadcasted_iota(jnp.int32, (span, w2, 1), 1)
    valid = (rows >= 1) & (rows <= height) & (cols >= 1) & (cols <= width)
    e_ref[...] = jnp.where(valid, h3, 0.0)

    # ---- 3x3 depthwise conv (scale folded into taps) + bias + ReLU6 ------
    wd = wd_ref[...]                                     # hoisted (9, hid)
    acc = jnp.zeros((tr_out, out_w, hid), jnp.float32)
    for ky in range(3):
        for kx in range(3):
            if stride == 1:
                tap = e_ref[pl.ds(ky, tr_out), pl.ds(kx, out_w), :]
            else:
                tap = e_ref[pl.ds(ky, tr_out, stride=stride),
                            pl.ds(kx, out_w, stride=stride), :]
            acc = acc + tap * wd[ky * 3 + kx, :]
    y = jnp.clip(acc + bd_ref[0], 0.0, 6.0)

    # ---- 1x1 project conv (bf16 MXU, f32 acc) + bias (+ residual) ---------
    y2 = y.reshape(tr_out * out_w, hid).astype(jnp.bfloat16)
    p2 = jnp.dot(y2, wp_ref[...], preferred_element_type=jnp.float32)
    p2 = p2 + bp_ref[...]
    p3 = p2.reshape(tr_out, out_w, p2.shape[-1])
    if has_shortcut:   # stride == 1 and c_in == c_out
        rstart = pl.multiple_of((row0 + 1) * w2, 8)
        res = x_ref[0, pl.ds(rstart, tr_out * w2), :]
        res = res.reshape(tr_out, w2, res.shape[-1])[:, 1:width + 1, :]
        p3 = p3 + res.astype(jnp.float32)
    o_ref[0] = p3.astype(o_ref.dtype)


# ---------------------------------------------------------------------------
# Wrappers
# ---------------------------------------------------------------------------

def inverted_residual_forward_nhwc(x_nhwc, params, *, stride, expand_ratio,
                                   max_row_tile=None):
    """Forward pass, NHWC in/out (use this when chaining blocks)."""
    n, h, w, c_in = x_nhwc.shape
    c_out = params["w_proj"].shape[1]
    hid = c_in * expand_ratio
    has_expand = expand_ratio != 1
    has_shortcut = (stride == 1) and (c_in == c_out)

    out_h = (h - 1) // stride + 1            # kernel=3, padding=1
    out_w = (w - 1) // stride + 1
    w2 = _round_up(w + 2, 8)                 # padded width, sublane aligned

    vmem_limit = _vmem_limit_bytes()
    tr_out = _pick_row_tile(out_h=out_h, out_w=out_w, w2=w2, hid=hid,
                            c_in=c_in, h=h, stride=stride, n=n,
                            vmem_limit=vmem_limit, max_row_tile=max_row_tile)
    n_tiles = pl.cdiv(out_h, tr_out)         # ragged last tile allowed
    span = (tr_out - 1) * stride + 3         # input rows (incl. halo) per tile
    # Pad input rows so every tile's (possibly ragged) window stays in bounds.
    h_pad = (n_tiles * tr_out - 1) * stride + 3
    pad_bot = h_pad - h - 1                  # >= 0 by construction

    # Halo-pad the *small* pre-expansion input (cheap), align width to 8 and
    # flatten (H, W) so each row window is one contiguous 2-D slice in-kernel.
    x = jnp.pad(x_nhwc.astype(jnp.float32),
                ((0, 0), (1, pad_bot), (1, w2 - w - 1), (0, 0)))
    x_flat = x.reshape(n, h_pad * w2, c_in)

    # Fold the inference-mode BN scale into the conv weights (bias stays).
    # 1x1 conv weights are cast to bf16 for native MXU throughput.
    args = [x_flat]
    in_specs = [pl.BlockSpec((1, h_pad * w2, c_in), lambda b, t: (b, 0, 0))]
    if has_expand:
        args += [
            (params["w_expand"] * params["s_expand"][None, :]).astype(jnp.bfloat16),
            params["b_expand"].reshape(1, hid).astype(jnp.float32),
        ]
        in_specs += [pl.BlockSpec((c_in, hid), lambda b, t: (0, 0)),
                     pl.BlockSpec((1, hid), lambda b, t: (0, 0))]
    args += [
        (params["w_dw"] * params["s_dw"]).reshape(9, hid).astype(jnp.float32),
        params["b_dw"].reshape(1, hid).astype(jnp.float32),
        (params["w_proj"] * params["s_proj"][None, :]).astype(jnp.bfloat16),
        params["b_proj"].reshape(1, c_out).astype(jnp.float32),
    ]
    in_specs += [pl.BlockSpec((9, hid), lambda b, t: (0, 0)),
                 pl.BlockSpec((1, hid), lambda b, t: (0, 0)),
                 pl.BlockSpec((hid, c_out), lambda b, t: (0, 0)),
                 pl.BlockSpec((1, c_out), lambda b, t: (0, 0))]

    kernel = functools.partial(
        _fused_ir_kernel, has_expand=has_expand, has_shortcut=has_shortcut,
        stride=stride, tr_out=tr_out, out_w=out_w, span=span, w2=w2,
        height=h, width=w)

    # Megacore: split the batch axis across TensorCores when n >= 2 so both
    # cores do not DMA the same full-image input block; only split row tiles
    # when there is a single image.
    if n >= 2:
        dims = ("parallel", "arbitrary")
    else:
        dims = ("arbitrary", "parallel")

    m_out = n * out_h * out_w
    flops = (2 * n * h * w * c_in * hid * (1 if has_expand else 0)
             + 18 * m_out * hid + 2 * m_out * hid * c_out)
    weight_bytes = sum(int(a.size) * a.dtype.itemsize for a in args[1:])
    bytes_accessed = int(x_flat.size) * 4 + m_out * c_out * 4 + weight_bytes
    cost = pl.CostEstimate(flops=int(flops), transcendentals=0,
                           bytes_accessed=int(bytes_accessed))

    out_nhwc = pl.pallas_call(
        kernel,
        out_shape=jax.ShapeDtypeStruct((n, out_h, out_w, c_out), jnp.float32),
        grid=(n, n_tiles),
        in_specs=in_specs,
        out_specs=pl.BlockSpec((1, tr_out, out_w, c_out),
                               lambda b, t: (b, t, 0, 0)),
        scratch_shapes=[pltpu.VMEM((span, w2, hid), jnp.float32)],
        compiler_params=pltpu.CompilerParams(
            dimension_semantics=dims,
            vmem_limit_bytes=vmem_limit),
        cost_estimate=cost,
    )(*args)
    return out_nhwc


def inverted_residual_forward(x_nchw, params, *, stride, expand_ratio,
                              max_row_tile=None):
    """Forward pass with NCHW in/out (PyTorch layout) — model-edge wrapper only;
    chained blocks should call the NHWC entry point to avoid layout round trips."""
    x_nhwc = jnp.transpose(x_nchw, (0, 2, 3, 1))
    out = inverted_residual_forward_nhwc(x_nhwc, params, stride=stride,
                                         expand_ratio=expand_ratio,
                                         max_row_tile=max_row_tile)
    return jnp.transpose(out, (0, 3, 1, 2))


# ---------------------------------------------------------------------------
# Parameter init (deterministic, eval-mode BN folded) and pure-JAX reference
# ---------------------------------------------------------------------------

def _fold_bn(keys, c, eps=1e-5):
    gamma = jax.random.uniform(keys[0], (c,), minval=0.5, maxval=1.5)
    beta = jax.random.normal(keys[1], (c,)) * 0.1
    mean = jax.random.normal(keys[2], (c,)) * 0.1
    var = jax.random.uniform(keys[3], (c,), minval=0.5, maxval=1.5)
    scale = gamma / jnp.sqrt(var + eps)
    bias = beta - mean * scale
    return scale.astype(jnp.float32), bias.astype(jnp.float32)


def make_params(key, c_in, c_out, expand_ratio):
    hid = c_in * expand_ratio
    ks = jax.random.split(key, 15)
    p = {}
    if expand_ratio != 1:
        p["w_expand"] = (jax.random.normal(ks[0], (c_in, hid)) * 0.2).astype(jnp.float32)
        p["s_expand"], p["b_expand"] = _fold_bn(ks[1:5], hid)
    p["w_dw"] = (jax.random.normal(ks[5], (3, 3, hid)) * 0.2).astype(jnp.float32)
    p["s_dw"], p["b_dw"] = _fold_bn(ks[6:10], hid)
    p["w_proj"] = (jax.random.normal(ks[10], (hid, c_out)) * 0.2).astype(jnp.float32)
    p["s_proj"], p["b_proj"] = _fold_bn(ks[11:15], c_out)
    return p


def reference_forward(x_nchw, params, *, stride, expand_ratio):
    x = jnp.transpose(x_nchw, (0, 2, 3, 1))
    c_in = x.shape[-1]
    c_out = params["w_proj"].shape[1]
    use_shortcut = (stride == 1) and (c_in == c_out)
    h = x
    if expand_ratio != 1:
        h = jnp.einsum("nhwc,cd->nhwd", h, params["w_expand"])
        h = jnp.clip(h * params["s_expand"] + params["b_expand"], 0.0, 6.0)
    c = h.shape[-1]
    dw = params["w_dw"].reshape(3, 3, 1, c)
    y = jax.lax.conv_general_dilated(
        h, dw, window_strides=(stride, stride), padding=((1, 1), (1, 1)),
        dimension_numbers=("NHWC", "HWIO", "NHWC"), feature_group_count=c)
    y = jnp.clip(y * params["s_dw"] + params["b_dw"], 0.0, 6.0)
    out = jnp.einsum("nhwc,cd->nhwd", y, params["w_proj"])
    out = out * params["s_proj"] + params["b_proj"]
    if use_shortcut:
        out = out + x
    return jnp.transpose(out, (0, 3, 1, 2))


# ---------------------------------------------------------------------------

if __name__ == "__main__":
    N, H, W = 2, 16, 16
    configs = [
        # (c_in, c_out, stride, expand_ratio, max_row_tile)
        (4, 4, 1, 6, None),   # expand + residual shortcut, single row tile
        (4, 8, 1, 6, None),   # expand, channel change -> no shortcut
        (8, 8, 1, 1, None),   # expand_ratio == 1 (no expand conv) + shortcut
        (4, 4, 1, 6, 6),      # ragged row tiling (16 = 6+6+4) + shortcut
        (4, 8, 2, 6, 3),      # stride=2 + ragged row tiling
    ]
    key = jax.random.PRNGKey(0)
    for c_in, c_out, stride, expand, max_rt in configs:
        key, kx, kp = jax.random.split(key, 3)
        x = jax.random.normal(kx, (N, c_in, H, W), dtype=jnp.float32)
        params = make_params(kp, c_in, c_out, expand)

        out = inverted_residual_forward(x, params, stride=stride,
                                        expand_ratio=expand,
                                        max_row_tile=max_rt)
        out = jax.block_until_ready(out)

        ref = reference_forward(x, params, stride=stride, expand_ratio=expand)
        out_h = (H - 1) // stride + 1
        out_w = (W - 1) // stride + 1
        assert out.shape == ref.shape == (N, c_out, out_h, out_w)
        err = float(jnp.max(jnp.abs(out - ref)))
        # bf16 MXU matmuls (f32 accumulation) -> loosened tolerance vs f32 ref.
        assert jnp.allclose(out, ref, atol=5e-2, rtol=2e-2), err

    print("KERNEL_OK")
</pallas_src>

<mosaic_0001>
module attributes {stable_mosaic.version = 11 : i64} {
  func.func @_fused_ir_kernel(%arg0: i32, %arg1: i32, %arg2: memref<1x432x4xf32, #tpu.memory_space<vmem>>, %arg3: memref<4x24xbf16, #tpu.memory_space<vmem>>, %arg4: memref<1x24xf32, #tpu.memory_space<vmem>>, %arg5: memref<9x24xf32, #tpu.memory_space<vmem>>, %arg6: memref<1x24xf32, #tpu.memory_space<vmem>>, %arg7: memref<24x4xbf16, #tpu.memory_space<vmem>>, %arg8: memref<1x4xf32, #tpu.memory_space<vmem>>, %arg9: memref<1x16x16x4xf32, #tpu.memory_space<vmem>>, %arg10: memref<18x24x24xf32, #tpu.memory_space<vmem>>) attributes {dimension_semantics = [#tpu.dimension_semantics<parallel>, #tpu.dimension_semantics<arbitrary>], iteration_bounds = array<i64: 2, 1>, scalar_prefetch = 0 : i64, scratch_operands = 1 : i64, tpu.core_type = #tpu.core_type<tc>, window_params = [{transform_indices = @transform_0, window_bounds = array<i64: 1, 432, 4>}, {pipeline_mode = #tpu.pipeline_mode<synchronous>, transform_indices = @transform_1, window_bounds = array<i64: 4, 24>}, {pipeline_mode = #tpu.pipeline_mode<synchronous>, transform_indices = @transform_2, window_bounds = array<i64: 1, 24>}, {pipeline_mode = #tpu.pipeline_mode<synchronous>, transform_indices = @transform_3, window_bounds = array<i64: 9, 24>}, {pipeline_mode = #tpu.pipeline_mode<synchronous>, transform_indices = @transform_4, window_bounds = array<i64: 1, 24>}, {pipeline_mode = #tpu.pipeline_mode<synchronous>, transform_indices = @transform_5, window_bounds = array<i64: 24, 4>}, {pipeline_mode = #tpu.pipeline_mode<synchronous>, transform_indices = @transform_6, window_bounds = array<i64: 1, 4>}, {transform_indices = @transform_7, window_bounds = array<i64: 1, 16, 16, 4>}]} {
    %c16_i32 = arith.constant 16 : i32
    %0 = arith.muli %arg1, %c16_i32 : i32
    %c24_i32 = arith.constant 24 : i32
    %1 = arith.muli %0, %c24_i32 : i32
    %2 = tpu.assume_multiple %1, 8 : i32
    %c0 = arith.constant 0 : index
    %3 = arith.index_cast %2 : i32 to index
    %c0_0 = arith.constant 0 : index
    %4 = vector.load %arg2[%c0, %3, %c0_0] : memref<1x432x4xf32, #tpu.memory_space<vmem>>, vector<1x432x4xf32>
    %5 = vector.shape_cast %4 : vector<1x432x4xf32> to vector<432x4xf32>
    %6 = arith.truncf %5 : vector<432x4xf32> to vector<432x4xbf16>
    %c0_1 = arith.constant 0 : index
    %c0_2 = arith.constant 0 : index
    %7 = vector.load %arg3[%c0_1, %c0_2] : memref<4x24xbf16, #tpu.memory_space<vmem>>, vector<4x24xbf16>
    %cst = arith.constant dense<0.000000e+00> : vector<432x24xf32>
    %8 = tpu.matmul %6, %7, %cst {dimension_numbers = #tpu.dot_dimension_numbers<[1], [0], [0], [1], [0, 0, 1, 1], [], []>} : vector<432x4xbf16>, vector<4x24xbf16>, vector<432x24xf32> -> vector<432x24xf32>
    %c0_3 = arith.constant 0 : index
    %c0_4 = arith.constant 0 : index
    %9 = vector.load %arg4[%c0_3, %c0_4] : memref<1x24xf32, #tpu.memory_space<vmem>>, vector<1x24xf32>
    %10 = vector.broadcast %9 : vector<1x24xf32> to vector<432x24xf32>
    %11 = arith.addf %8, %10 : vector<432x24xf32>
    %cst_5 = arith.constant 0.000000e+00 : f32
    %cst_6 = arith.constant 6.000000e+00 : f32
    %12 = vector.broadcast %cst_5 : f32 to vector<432x24xf32>
    %13 = arith.maximumf %12, %11 : vector<432x24xf32>
    %14 = vector.broadcast %cst_6 : f32 to vector<432x24xf32>
    %15 = arith.minimumf %14, %13 : vector<432x24xf32>
    %16 = vector.shape_cast %15 : vector<432x24xf32> to vector<18x24x24xf32>
    %17 = tpu.iota {dimensions = array<i32: 0>} : vector<18x24x1xi32>
    %18 = vector.broadcast %0 : i32 to vector<18x24x1xi32>
    %19 = arith.addi %17, %18 : vector<18x24x1xi32>
    %20 = tpu.iota {dimensions = array<i32: 1>} : vector<18x24x1xi32>
    %c1_i32 = arith.constant 1 : i32
    %21 = vector.broadcast %c1_i32 : i32 to vector<18x24x1xi32>
    %22 = arith.cmpi sge, %19, %21 : vector<18x24x1xi32>
    %c16_i32_7 = arith.constant 16 : i32
    %23 = vector.broadcast %c16_i32_7 : i32 to vector<18x24x1xi32>
    %24 = arith.cmpi sle, %19, %23 : vector<18x24x1xi32>
    %25 = arith.andi %22, %24 : vector<18x24x1xi1>
    %c1_i32_8 = arith.constant 1 : i32
    %26 = vector.broadcast %c1_i32_8 : i32 to vector<18x24x1xi32>
    %27 = arith.cmpi sge, %20, %26 : vector<18x24x1xi32>
    %28 = arith.andi %25, %27 : vector<18x24x1xi1>
    %c16_i32_9 = arith.constant 16 : i32
    %29 = vector.broadcast %c16_i32_9 : i32 to vector<18x24x1xi32>
    %30 = arith.cmpi sle, %20, %29 : vector<18x24x1xi32>
    %31 = arith.andi %28, %30 : vector<18x24x1xi1>
    %cst_10 = arith.constant 0.000000e+00 : f32
    %32 = vector.shape_cast %31 : vector<18x24x1xi1> to vector<18x24x1xi1>
    %33 = vector.broadcast %32 : vector<18x24x1xi1> to vector<18x24x24xi1>
    %34 = vector.broadcast %cst_10 : f32 to vector<18x24x24xf32>
    %35 = arith.select %33, %16, %34 : vector<18x24x24xi1>, vector<18x24x24xf32>
    %c0_11 = arith.constant 0 : index
    %c0_12 = arith.constant 0 : index
    %c0_13 = arith.constant 0 : index
    %36 = vector.load %arg10[%c0_11, %c0_12, %c0_13] : memref<18x24x24xf32, #tpu.memory_space<vmem>>, vector<18x24x24xf32>
    tpu.vector_store %arg10[%c0_11, %c0_12, %c0_13], %35 {strides = array<i32>} : memref<18x24x24xf32, #tpu.memory_space<vmem>>, vector<18x24x24xf32>,
    %c0_14 = arith.constant 0 : index
    %c0_15 = arith.constant 0 : index
    %37 = vector.load %arg5[%c0_14, %c0_15] : memref<9x24xf32, #tpu.memory_space<vmem>>, vector<9x24xf32>
    %cst_16 = arith.constant 0.000000e+00 : f32
    %38 = vector.broadcast %cst_16 : f32 to vector<16x16x24xf32>
    %c0_17 = arith.constant 0 : index
    %c0_18 = arith.constant 0 : index
    %c0_19 = arith.constant 0 : index
    %39 = vector.load %arg10[%c0_17, %c0_18, %c0_19] : memref<18x24x24xf32, #tpu.memory_space<vmem>>, vector<16x16x24xf32>
    %40 = vector.extract_strided_slice %37 {offsets = [0, 0], sizes = [1, 24], strides = [1, 1]} : vector<9x24xf32> to vector<1x24xf32>
    %41 = vector.shape_cast %40 : vector<1x24xf32> to vector<24xf32>
    %42 = vector.shape_cast %41 : vector<24xf32> to vector<1x1x24xf32>
    %43 = vector.broadcast %42 : vector<1x1x24xf32> to vector<16x16x24xf32>
    %44 = arith.mulf %39, %43 : vector<16x16x24xf32>
    %45 = arith.addf %38, %44 : vector<16x16x24xf32>
    %c0_20 = arith.constant 0 : index
    %c1 = arith.constant 1 : index
    %c0_21 = arith.constant 0 : index
    %46 = vector.load %arg10[%c0_20, %c1, %c0_21] : memref<18x24x24xf32, #tpu.memory_space<vmem>>, vector<16x16x24xf32>
    %47 = vector.extract_strided_slice %37 {offsets = [1, 0], sizes = [1, 24], strides = [1, 1]} : vector<9x24xf32> to vector<1x24xf32>
    %48 = vector.shape_cast %47 : vector<1x24xf32> to vector<24xf32>
    %49 = vector.shape_cast %48 : vector<24xf32> to vector<1x1x24xf32>
    %50 = vector.broadcast %49 : vector<1x1x24xf32> to vector<16x16x24xf32>
    %51 = arith.mulf %46, %50 : vector<16x16x24xf32>
    %52 = arith.addf %45, %51 : vector<16x16x24xf32>
    %c0_22 = arith.constant 0 : index
    %c2 = arith.constant 2 : index
    %c0_23 = arith.constant 0 : index
    %53 = vector.load %arg10[%c0_22, %c2, %c0_23] : memref<18x24x24xf32, #tpu.memory_space<vmem>>, vector<16x16x24xf32>
    %54 = vector.extract_strided_slice %37 {offsets = [2, 0], sizes = [1, 24], strides = [1, 1]} : vector<9x24xf32> to vector<1x24xf32>
    %55 = vector.shape_cast %54 : vector<1x24xf32> to vector<24xf32>
    %56 = vector.shape_cast %55 : vector<24xf32> to vector<1x1x24xf32>
    %57 = vector.broadcast %56 : vector<1x1x24xf32> to vector<16x16x24xf32>
    %58 = arith.mulf %53, %57 : vector<16x16x24xf32>
    %59 = arith.addf %52, %58 : vector<16x16x24xf32>
    %c1_24 = arith.constant 1 : index
    %c0_25 = arith.constant 0 : index
    %c0_26 = arith.constant 0 : index
    %60 = vector.load %arg10[%c1_24, %c0_25, %c0_26] : memref<18x24x24xf32, #tpu.memory_space<vmem>>, vector<16x16x24xf32>
    %61 = vector.extract_strided_slice %37 {offsets = [3, 0], sizes = [1, 24], strides = [1, 1]} : vector<9x24xf32> to vector<1x24xf32>
    %62 = vector.shape_cast %61 : vector<1x24xf32> to vector<24xf32>
    %63 = vector.shape_cast %62 : vector<24xf32> to vector<1x1x24xf32>
    %64 = vector.broadcast %63 : vector<1x1x24xf32> to vector<16x16x24xf32>
    %65 = arith.mulf %60, %64 : vector<16x16x24xf32>
    %66 = arith.addf %59, %65 : vector<16x16x24xf32>
    %c1_27 = arith.constant 1 : index
    %c1_28 = arith.constant 1 : index
    %c0_29 = arith.constant 0 : index
    %67 = vector.load %arg10[%c1_27, %c1_28, %c0_29] : memref<18x24x24xf32, #tpu.memory_space<vmem>>, vector<16x16x24xf32>
    %68 = vector.extract_strided_slice %37 {offsets = [4, 0], sizes = [1, 24], strides = [1, 1]} : vector<9x24xf32> to vector<1x24xf32>
    %69 = vector.shape_cast %68 : vector<1x24xf32> to vector<24xf32>
    %70 = vector.shape_cast %69 : vector<24xf32> to vector<1x1x24xf32>
    %71 = vector.broadcast %70 : vector<1x1x24xf32> to vector<16x16x24xf32>
    %72 = arith.mulf %67, %71 : vector<16x16x24xf32>
    %73 = arith.addf %66, %72 : vector<16x16x24xf32>
    %c1_30 = arith.constant 1 : index
    %c2_31 = arith.constant 2 : index
    %c0_32 = arith.constant 0 : index
    %74 = vector.load %arg10[%c1_30, %c2_31, %c0_32] : memref<18x24x24xf32, #tpu.memory_space<vmem>>, vector<16x16x24xf32>
    %75 = vector.extract_strided_slice %37 {offsets = [5, 0], sizes = [1, 24], strides = [1, 1]} : vector<9x24xf32> to vector<1x24xf32>
    %76 = vector.shape_cast %75 : vector<1x24xf32> to vector<24xf32>
    %77 = vector.shape_cast %76 : vector<24xf32> to vector<1x1x24xf32>
    %78 = vector.broadcast %77 : vector<1x1x24xf32> to vector<16x16x24xf32>
    %79 = arith.mulf %74, %78 : vector<16x16x24xf32>
    %80 = arith.addf %73, %79 : vector<16x16x24xf32>
    %c2_33 = arith.constant 2 : index
    %c0_34 = arith.constant 0 : index
    %c0_35 = arith.constant 0 : index
    %81 = vector.load %arg10[%c2_33, %c0_34, %c0_35] : memref<18x24x24xf32, #tpu.memory_space<vmem>>, vector<16x16x24xf32>
    %82 = vector.extract_strided_slice %37 {offsets = [6, 0], sizes = [1, 24], strides = [1, 1]} : vector<9x24xf32> to vector<1x24xf32>
    %83 = vector.shape_cast %82 : vector<1x24xf32> to vector<24xf32>
    %84 = vector.shape_cast %83 : vector<24xf32> to vector<1x1x24xf32>
    %85 = vector.broadcast %84 : vector<1x1x24xf32> to vector<16x16x24xf32>
    %86 = arith.mulf %81, %85 : vector<16x16x24xf32>
    %87 = arith.addf %80, %86 : vector<16x16x24xf32>
    %c2_36 = arith.constant 2 : index
    %c1_37 = arith.constant 1 : index
    %c0_38 = arith.constant 0 : index
    %88 = vector.load %arg10[%c2_36, %c1_37, %c0_38] : memref<18x24x24xf32, #tpu.memory_space<vmem>>, vector<16x16x24xf32>
    %89 = vector.extract_strided_slice %37 {offsets = [7, 0], sizes = [1, 24], strides = [1, 1]} : vector<9x24xf32> to vector<1x24xf32>
    %90 = vector.shape_cast %89 : vector<1x24xf32> to vector<24xf32>
    %91 = vector.shape_cast %90 : vector<24xf32> to vector<1x1x24xf32>
    %92 = vector.broadcast %91 : vector<1x1x24xf32> to vector<16x16x24xf32>
    %93 = arith.mulf %88, %92 : vector<16x16x24xf32>
    %94 = arith.addf %87, %93 : vector<16x16x24xf32>
    %c2_39 = arith.constant 2 : index
    %c2_40 = arith.constant 2 : index
    %c0_41 = arith.constant 0 : index
    %95 = vector.load %arg10[%c2_39, %c2_40, %c0_41] : memref<18x24x24xf32, #tpu.memory_space<vmem>>, vector<16x16x24xf32>
    %96 = vector.extract_strided_slice %37 {offsets = [8, 0], sizes = [1, 24], strides = [1, 1]} : vector<9x24xf32> to vector<1x24xf32>
    %97 = vector.shape_cast %96 : vector<1x24xf32> to vector<24xf32>
    %98 = vector.shape_cast %97 : vector<24xf32> to vector<1x1x24xf32>
    %99 = vector.broadcast %98 : vector<1x1x24xf32> to vector<16x16x24xf32>
    %100 = arith.mulf %95, %99 : vector<16x16x24xf32>
    %101 = arith.addf %94, %100 : vector<16x16x24xf32>
    %c0_42 = arith.constant 0 : index
    %c0_43 = arith.constant 0 : index
    %102 = vector.load %arg6[%c0_42, %c0_43] : memref<1x24xf32, #tpu.memory_space<vmem>>, vector<1x24xf32>
    %103 = vector.shape_cast %102 : vector<1x24xf32> to vector<24xf32>
    %104 = vector.shape_cast %103 : vector<24xf32> to vector<1x1x24xf32>
    %105 = vector.broadcast %104 : vector<1x1x24xf32> to vector<16x16x24xf32>
    %106 = arith.addf %101, %105 : vector<16x16x24xf32>
    %cst_44 = arith.constant 0.000000e+00 : f32
    %cst_45 = arith.constant 6.000000e+00 : f32
    %107 = vector.broadcast %cst_44 : f32 to vector<16x16x24xf32>
    %108 = arith.maximumf %107, %106 : vector<16x16x24xf32>
    %109 = vector.broadcast %cst_45 : f32 to vector<16x16x24xf32>
    %110 = arith.minimumf %109, %108 : vector<16x16x24xf32>
    %111 = vector.shape_cast %110 : vector<16x16x24xf32> to vector<256x24xf32>
    %112 = arith.truncf %111 : vector<256x24xf32> to vector<256x24xbf16>
    %c0_46 = arith.constant 0 : index
    %c0_47 = arith.constant 0 : index
    %113 = vector.load %arg7[%c0_46, %c0_47] : memref<24x4xbf16, #tpu.memory_space<vmem>>, vector<24x4xbf16>
    %cst_48 = arith.constant dense<0.000000e+00> : vector<256x4xf32>
    %114 = tpu.matmul %112, %113, %cst_48 {dimension_numbers = #tpu.dot_dimension_numbers<[1], [0], [0], [1], [0, 0, 1, 1], [], []>} : vector<256x24xbf16>, vector<24x4xbf16>, vector<256x4xf32> -> vector<256x4xf32>
    %c0_49 = arith.constant 0 : index
    %c0_50 = arith.constant 0 : index
    %115 = vector.load %arg8[%c0_49, %c0_50] : memref<1x4xf32, #tpu.memory_space<vmem>>, vector<1x4xf32>
    %116 = vector.broadcast %115 : vector<1x4xf32> to vector<256x4xf32>
    %117 = arith.addf %114, %116 : vector<256x4xf32>
    %118 = vector.shape_cast %117 : vector<256x4xf32> to vector<16x16x4xf32>
    %c1_i32_51 = arith.constant 1 : i32
    %119 = arith.addi %0, %c1_i32_51 : i32
    %c24_i32_52 = arith.constant 24 : i32
    %120 = arith.muli %119, %c24_i32_52 : i32
    %121 = tpu.assume_multiple %120, 8 : i32
    %c0_53 = arith.constant 0 : index
    %122 = arith.index_cast %121 : i32 to index
    %c0_54 = arith.constant 0 : index
    %123 = vector.load %arg2[%c0_53, %122, %c0_54] : memref<1x432x4xf32, #tpu.memory_space<vmem>>, vector<1x384x4xf32>
    %124 = vector.shape_cast %123 : vector<1x384x4xf32> to vector<384x4xf32>
    %125 = vector.shape_cast %124 : vector<384x4xf32> to vector<16x24x4xf32>
    %126 = vector.extract_strided_slice %125 {offsets = [0, 1, 0], sizes = [16, 16, 4], strides = [1, 1, 1]} : vector<16x24x4xf32> to vector<16x16x4xf32>
    %127 = arith.addf %118, %126 : vector<16x16x4xf32>
    %c0_55 = arith.constant 0 : index
    %c0_56 = arith.constant 0 : index
    %c0_57 = arith.constant 0 : index
    %c0_58 = arith.constant 0 : index
    %128 = vector.load %arg9[%c0_55, %c0_56, %c0_57, %c0_58] : memref<1x16x16x4xf32, #tpu.memory_space<vmem>>, vector<1x16x16x4xf32>
    %129 = vector.shape_cast %128 : vector<1x16x16x4xf32> to vector<16x16x4xf32>
    %130 = vector.shape_cast %127 : vector<16x16x4xf32> to vector<1x16x16x4xf32>
    tpu.vector_store %arg9[%c0_55, %c0_56, %c0_57, %c0_58], %130 {strides = array<i32>} : memref<1x16x16x4xf32, #tpu.memory_space<vmem>>, vector<1x16x16x4xf32>,
    return
  }
  func.func @transform_0(%arg0: i32, %arg1: i32) -> (i32, i32, i32) {
    %c0_i32 = arith.constant 0 : i32
    %c0_i32_0 = arith.constant 0 : i32
    %c0_i32_1 = arith.constant 0 : i32
    return %arg0, %c0_i32, %c0_i32_0 : i32, i32, i32
  }
  func.func @transform_1(%arg0: i32, %arg1: i32) -> (i32, i32) {
    %c0_i32 = arith.constant 0 : i32
    %c0_i32_0 = arith.constant 0 : i32
    %c0_i32_1 = arith.constant 0 : i32
    return %c0_i32, %c0_i32_0 : i32, i32
  }
  func.func @transform_2(%arg0: i32, %arg1: i32) -> (i32, i32) {
    %c0_i32 = arith.constant 0 : i32
    %c0_i32_0 = arith.constant 0 : i32
    %c0_i32_1 = arith.constant 0 : i32
    return %c0_i32, %c0_i32_0 : i32, i32
  }
  func.func @transform_3(%arg0: i32, %arg1: i32) -> (i32, i32) {
    %c0_i32 = arith.constant 0 : i32
    %c0_i32_0 = arith.constant 0 : i32
    %c0_i32_1 = arith.constant 0 : i32
    return %c0_i32, %c0_i32_0 : i32, i32
  }
  func.func @transform_4(%arg0: i32, %arg1: i32) -> (i32, i32) {
    %c0_i32 = arith.constant 0 : i32
    %c0_i32_0 = arith.constant 0 : i32
    %c0_i32_1 = arith.constant 0 : i32
    return %c0_i32, %c0_i32_0 : i32, i32
  }
  func.func @transform_5(%arg0: i32, %arg1: i32) -> (i32, i32) {
    %c0_i32 = arith.constant 0 : i32
    %c0_i32_0 = arith.constant 0 : i32
    %c0_i32_1 = arith.constant 0 : i32
    return %c0_i32, %c0_i32_0 : i32, i32
  }
  func.func @transform_6(%arg0: i32, %arg1: i32) -> (i32, i32) {
    %c0_i32 = arith.constant 0 : i32
    %c0_i32_0 = arith.constant 0 : i32
    %c0_i32_1 = arith.constant 0 : i32
    return %c0_i32, %c0_i32_0 : i32, i32
  }
  func.func @transform_7(%arg0: i32, %arg1: i32) -> (i32, i32, i32, i32) {
    %c0_i32 = arith.constant 0 : i32
    %c0_i32_0 = arith.constant 0 : i32
    %c0_i32_1 = arith.constant 0 : i32
    return %arg0, %arg1, %c0_i32, %c0_i32_0 : i32, i32, i32, i32
  }
}

</mosaic_0001>

<bundles_post_ra>
// kernel: tpu_custom_call.1
= control target key start
LH: loop header
LB: loop body
LE: loop exit
PB: predicated region body
PF: predicated region fallthrough
CT: control target
= control target key end

     0   :  { %s3278_s24 = smov 0   ;;  %s3280_s25 = smov 0   ;;  %s4587_s0 = inlined_call_operand.vmem [shape: f32[2,432,4], index: 0, kind: input, shape index: {}]   ;;  %s4588_s1 = inlined_call_operand.vmem [shape: bf16[4,24], index: 1, kind: input, shape index: {}]   ;;  %s4589_s2 = inlined_call_operand.vmem [shape: f32[1,24], index: 2, kind: input, shape index: {}]   ;;  %s4590_s3 = inlined_call_operand.vmem [shape: f32[9,24], index: 3, kind: input, shape index: {}]   ;;  %s4591_s4 = inlined_call_operand.vmem [shape: f32[1,24], index: 4, kind: input, shape index: {}]   ;;  %s4592_s5 = inlined_call_operand.vmem [shape: bf16[24,4], index: 5, kind: input, shape index: {}]   ;;  %s4593_s6 = inlined_call_operand.vmem [shape: f32[1,4], index: 6, kind: input, shape index: {}]   ;;  %s4594_s7 = inlined_call_operand.vmem [shape: f32[2,16,16,4], index: 7, kind: output, shape index: {}]  }
   0x1   :  { %s3282_s26 = smov 0  }
   0x2 LB: > { %s29_s27 = sadd.s32 1, %s3230_s25  ;;  %p2875_p0 = scmp.ge.s32.totalorder %s3234_s26, 1  ;;  %s3234_s26 = sphi %s3282_s26, %s17_s26   ;;  %s3230_s25 = sphi %s3280_s25, %s4596_s25   ;;  %s3226_s24 = sphi %s3278_s24, %s4595_s24  }
   0x3   : > { %p31_p1 = scmp.ge.s32.totalorder %s29_s27, 2  ;;  %p251_p2 = scmp.lt.s32.totalorder %s3234_s26, 3 }
   0x5   : > { %s4598_s27 = smov (%p31_p1, %s29_s27), 0  ;;  %p252_p3 = pnand %p2875_p0, %p251_p2 }
   0x6   : > { %v389_v0 = vld [vmem:[%s4588_s1] sm:$0x3] (!%p252_p3)  ;;  %vm479_vm0 = vcmask (!%p252_p3), 1041408   ;;  %p288_p4 = scmp.lt.s32.totalorder (!%p252_p3), %s3226_s24, 1  ;;  %v3236_v1 = vmov (!%p252_p3), 0.0   ;;  %vm3237_vm1 = vmmov (!%p252_p3), 0  }
   0x7   : > { %255 = sbr.rel (%p252_p3) target bundleno = 689 (0x2b1), region = 48  ;;  %3025 = vmatprep.subr.bf16.mxu0 (!%p252_p3), %v3236_v1  ;;  %v481_v2 = vsel (!%p252_p3), %vm479_vm0, %v389_v0, 0  ;;  %3027 = vmatprep.mubr.msk.bf16.mxu0 (!%p252_p3), %vm3237_vm1, %v3236_v1  ;;  %vm397_vm2 = vcmask (!%p252_p3), 31744   ;;  %vm1192_vm3 = vcmask (!%p252_p3), 195584   ;;  %vm2337_vm4 = vcmask (!%p252_p3), 1043456  }
   0x8   : > { %3026 = vmatpush3.bf16.msra.mxu0 (!%p252_p3), %v481_v2  ;;  %3171 = vmatprep.subr.bf16.mxu1 (!%p252_p3), %v3236_v1  ;;  %1193 = vst.msk [vmem:[#allocation2] sm:$0xff] (!%p252_p3), %vm1192_vm3, %v3236_v1  ;;  %1194 = vst.msk [vmem:[#allocation2 + $0x8] sm:$0xff] (!%p252_p3), %vm1192_vm3, %v3236_v1  ;;  %vm2601_vm7 = vcmask (!%p252_p3), 1046528  }
   0x9   : > { %3172 = vmatpush3.bf16.msra.mxu1 (!%p252_p3), %v481_v2  ;;  %3099 = vmatprep.mubr.msk.bf16.mxu1 (!%p252_p3), %vm3237_vm1, %v3236_v1  ;;  %1195 = vst.msk [vmem:[#allocation2 + $0x10] sm:$0xff] (!%p252_p3), %vm1192_vm3, %v3236_v1  ;;  %1244 = vst.msk [vmem:[#allocation2 + $0x198] sm:$0xff] (!%p252_p3), %vm1192_vm3, %v3236_v1 }
   0xa   : > { %1245 = vst.msk [vmem:[#allocation2 + $0x1a0] sm:$0xff] (!%p252_p3), %vm1192_vm3, %v3236_v1  ;;  %1246 = vst.msk [vmem:[#allocation2 + $0x1a8] sm:$0xff] (!%p252_p3), %vm1192_vm3, %v3236_v1 }
   0xe   : > { %s4600_s24 = smov (!%p288_p4, %s3226_s24), 1 }
   0xf   : > { %s3174_s30 = smul.u32 432, %s4600_s24  ;;  %s2978_s13 = sshll.u32 %s4600_s24, 8 }
  0x10   : > { %s4409_s16 = scalar_lea.vmem %s4594_s7, %s2978_s13 }
  0x11   : > { %s3311_s10 = scalar_lea.vmem %s4587_s0, %s3174_s30 }
  0x12   : > { %v308_v3 = vld [vmem:[%s3311_s10] sm:$0xff]  ;;  %v309_v4 = vld [vmem:[%s3311_s10 + $0x8] sm:$0xff]  ;;  %v310_v6 = vld [vmem:[%s3311_s10 + $0x10] sm:$0xff] }
  0x13   : > { %v362_v5 = vpack.c.bf16 %v309_v4, %v308_v3  ;;  %v311_v7 = vld [vmem:[%s3311_s10 + $0x18] sm:$0xff]  ;;  %v344_v9 = vld [vmem:[%s3311_s10 + $0x120] sm:$0xff]  ;;  %v345_v10 = vld [vmem:[%s3311_s10 + $0x128] sm:$0xff] }
  0x14   : > { %v363_v8 = vpack.c.bf16 %v311_v7, %v310_v6  ;;  %v380_v11 = vpack.c.bf16 %v345_v10, %v344_v9  ;;  %v346_v12 = vld [vmem:[%s3311_s10 + $0x130] sm:$0xff]  ;;  %v347_v13 = vld [vmem:[%s3311_s10 + $0x138] sm:$0xff]  ;;  %v312_v14 = vld [vmem:[%s3311_s10 + $0x20] sm:$0xff] }
  0x15   : > { %3028 = vmatmul.mubr.msk.bf16.vlgmr.msra.gmra.mrb[0].mxu0 %vm397_vm2, %v362_v5  ;;  %v313_v15 = vld [vmem:[%s3311_s10 + $0x28] sm:$0xff]  ;;  %v381_v16 = vpack.c.bf16 %v347_v13, %v346_v12  ;;  %v348_v18 = vld [vmem:[%s3311_s10 + $0x140] sm:$0xff]  ;;  %v314_v20 = vld [vmem:[%s3311_s10 + $0x30] sm:$0xff] }
  0x16   : > { %3031 = vmatprep.mubr.msk.bf16.mxu0 %vm3237_vm1, %v3236_v1  ;;  %3100 = vmatmul.mubr.msk.bf16.vlgmr.msra.gmra.mrb[0].mxu1 %vm397_vm2, %v380_v11  ;;  %v364_v17 = vpack.c.bf16 %v313_v15, %v312_v14  ;;  %v349_v19 = vld [vmem:[%s3311_s10 + $0x148] sm:$0xff]  ;;  %v315_v21 = vld [vmem:[%s3311_s10 + $0x38] sm:$0xff]  ;;  %v350_v24 = vld [vmem:[%s3311_s10 + $0x150] sm:$0xff] }
  0x17   : > { %3103 = vmatprep.mubr.msk.bf16.mxu1 %vm3237_vm1, %v3236_v1  ;;  %v382_v22 = vpack.c.bf16 %v349_v19, %v348_v18  ;;  %v365_v23 = vpack.c.bf16 %v315_v21, %v314_v20  ;;  %v351_v25 = vld [vmem:[%s3311_s10 + $0x158] sm:$0xff]  ;;  %v316_v26 = vld [vmem:[%s3311_s10 + $0x40] sm:$0xff]  ;;  %v317_v27 = vld [vmem:[%s3311_s10 + $0x48] sm:$0xff] }
  0x18   : > { %v383_v28 = vpack.c.bf16 %v351_v25, %v350_v24  ;;  %v366_v29 = vpack.c.bf16 %v317_v27, %v316_v26  ;;  %v352_v30 = vld [vmem:[%s3311_s10 + $0x160] sm:$0xff]  ;;  %v353_v31 = vld [vmem:[%s3311_s10 + $0x168] sm:$0xff]  ;;  %v318_v32 = vld [vmem:[%s3311_s10 + $0x50] sm:$0xff]  ;;  %v858_v25 = vlaneseq }
  0x19   : > { %v319_v33 = vld [vmem:[%s3311_s10 + $0x58] sm:$0xff]  ;;  %v384_v34 = vpack.c.bf16 %v353_v31, %v352_v30  ;;  %v354_v36 = vld [vmem:[%s3311_s10 + $0x170] sm:$0xff]  ;;  %v320_v38 = vld [vmem:[%s3311_s10 + $0x60] sm:$0xff] }
  0x1a   : > { %v367_v35 = vpack.c.bf16 %v319_v33, %v318_v32  ;;  %v355_v37 = vld [vmem:[%s3311_s10 + $0x178] sm:$0xff]  ;;  %v321_v39 = vld [vmem:[%s3311_s10 + $0x68] sm:$0xff]  ;;  %v356_v42 = vld [vmem:[%s3311_s10 + $0x180] sm:$0xff] }
  0x1b   : > { %v385_v40 = vpack.c.bf16 %v355_v37, %v354_v36  ;;  %v368_v41 = vpack.c.bf16 %v321_v39, %v320_v38  ;;  %v357_v43 = vld [vmem:[%s3311_s10 + $0x188] sm:$0xff]  ;;  %v322_v44 = vld [vmem:[%s3311_s10 + $0x70] sm:$0xff]  ;;  %v323_v45 = vld [vmem:[%s3311_s10 + $0x78] sm:$0xff] }
  0x1c   : > { %v386_v46 = vpack.c.bf16 %v357_v43, %v356_v42  ;;  %v369_v47 = vpack.c.bf16 %v323_v45, %v322_v44  ;;  %v358_v48 = vld [vmem:[%s3311_s10 + $0x190] sm:$0xff]  ;;  %v359_v49 = vld [vmem:[%s3311_s10 + $0x198] sm:$0xff]  ;;  %v324_v50 = vld [vmem:[%s3311_s10 + $0x80] sm:$0xff] }
  0x1d   : > { %3032 = vmatmul.mubr.msk.bf16.gmra.mrb[4].mxu0 %vm397_vm2, %v363_v8  ;;  %v325_v51 = vld [vmem:[%s3311_s10 + $0x88] sm:$0xff]  ;;  %v387_v52 = vpack.c.bf16 %v359_v49, %v358_v48  ;;  %v326_v54 = vld [vmem:[%s3311_s10 + $0x90] sm:$0xff]  ;;  %v327_v55 = vld [vmem:[%s3311_s10 + $0x98] sm:$0xff] }
  0x1e   : > { %3035 = vmatprep.mubr.msk.bf16.mxu0 %vm3237_vm1, %v3236_v1  ;;  %3104 = vmatmul.mubr.msk.bf16.gmra.mrb[4].mxu1 %vm397_vm2, %v381_v16  ;;  %v370_v53 = vpack.c.bf16 %v325_v51, %v324_v50  ;;  %v371_v56 = vpack.c.bf16 %v327_v55, %v326_v54  ;;  %v328_v57 = vld [vmem:[%s3311_s10 + $0xa0] sm:$0xff]  ;;  %v329_v58 = vld [vmem:[%s3311_s10 + $0xa8] sm:$0xff]  ;;  %v330_v60 = vld [vmem:[%s3311_s10 + $0xb0] sm:$0xff] }
  0x1f   : > { %3107 = vmatprep.mubr.msk.bf16.mxu1 %vm3237_vm1, %v3236_v1  ;;  %v372_v59 = vpack.c.bf16 %v329_v58, %v328_v57  ;;  %v331_v61 = vld [vmem:[%s3311_s10 + $0xb8] sm:$0xff]  ;;  %v332_v63 = vld [vmem:[%s3311_s10 + $0xc0] sm:$0xff]  ;;  %v333_v0 = vld [vmem:[%s3311_s10 + $0xc8] sm:$0xff] }
  0x20   : > { %v373_v62 = vpack.c.bf16 %v331_v61, %v330_v60  ;;  %v374_v2 = vpack.c.bf16 %v333_v0, %v332_v63  ;;  %v334_v3 = vld [vmem:[%s3311_s10 + $0xd0] sm:$0xff]  ;;  %v335_v4 = vld [vmem:[%s3311_s10 + $0xd8] sm:$0xff]  ;;  %v336_v6 = vld [vmem:[%s3311_s10 + $0xe0] sm:$0xff] }
  0x21   : > { %v375_v5 = vpack.c.bf16 %v335_v4, %v334_v3  ;;  %v337_v7 = vld [vmem:[%s3311_s10 + $0xe8] sm:$0xff]  ;;  %v338_v9 = vld [vmem:[%s3311_s10 + $0xf0] sm:$0xff]  ;;  %v339_v10 = vld [vmem:[%s3311_s10 + $0xf8] sm:$0xff] }
  0x22   : > { %v376_v8 = vpack.c.bf16 %v337_v7, %v336_v6  ;;  %v377_v11 = vpack.c.bf16 %v339_v10, %v338_v9  ;;  %v340_v12 = vld [vmem:[%s3311_s10 + $0x100] sm:$0xff]  ;;  %v341_v13 = vld [vmem:[%s3311_s10 + $0x108] sm:$0xff]  ;;  %v342_v15 = vld [vmem:[%s3311_s10 + $0x110] sm:$0xff] }
  0x23   : > { %v378_v14 = vpack.c.bf16 %v341_v13, %v340_v12  ;;  %v343_v16 = vld [vmem:[%s3311_s10 + $0x118] sm:$0xff]  ;;  %v360_v18 = vld [vmem:[%s3311_s10 + $0x1a0] sm:$0xff]  ;;  %v361_v19 = vld [vmem:[%s3311_s10 + $0x1a8] sm:$0xff] }
  0x24   : > { %v388_v20 = vpack.c.bf16 %v361_v19, %v360_v18  ;;  %v3201_v21 = vld [vmem:[%s4592_s5] sm:$0xff]   ;;  %v1350_v61 = vld [vmem:[#allocation2 + $0x9] sm:$0xff] }
  0x25   : > { %3036 = vmatmul.mubr.msk.bf16.gmra.mrb[8].mxu0 %vm397_vm2, %v364_v17  ;;  %v379_v17 = vpack.c.bf16 %v343_v16, %v342_v15  ;;  %3135 = vmatprep.subr.bf16.mxu1 %v3201_v21  ;;  %v1249_v48 = vld [vmem:[#allocation2] sm:$0xff] }
  0x26   : > { %3039 = vmatprep.mubr.msk.bf16.mxu0 %vm3237_vm1, %v3236_v1  ;;  %3108 = vmatmul.mubr.msk.bf16.gmra.mrb[8].mxu1 %vm397_vm2, %v382_v22  ;;  %v1349_v49 = vld [vmem:[#allocation2 + $0x1] sm:$0xff] }
  0x27   : > { %3111 = vmatprep.mubr.msk.bf16.mxu1 %vm3237_vm1, %v3236_v1  ;;  %3136 = vmatpush3.bf16.msra.mxu1 %v3201_v21 }
  0x2d   : > { %3040 = vmatmul.mubr.msk.bf16.gmra.mrb[12].mxu0 %vm397_vm2, %v365_v23 }
  0x2e   : > { %3043 = vmatprep.mubr.msk.bf16.mxu0 %vm3237_vm1, %v3236_v1  ;;  %3112 = vmatmul.mubr.msk.bf16.gmra.mrb[12].mxu1 %vm397_vm2, %v383_v28  ;;  %v3462_v28 = vshrl.u32 %v858_v25, 7 }
  0x2f   : > { %3115 = vmatprep.mubr.msk.bf16.mxu1 %vm3237_vm1, %v3236_v1 }
  0x30   : > { %v1283_v30 = vsub.s32 0, %v3462_v28  ;;  %v1383_v31 = vsub.s32 1, %v3462_v28  ;;  %vm916_vm5 = vcmp.ge.s32.totalorder %v3462_v28, 1  ;;  %v3489_v54 = vadd.s32 16, %v3462_v28 }
  0x31   : > { %v1885_v25 = vsub.s32 6, %v3462_v28 }
  0x32   : > { %vm975_vm6 = vcmp.le.s32.totalorder %v3489_v54, 16 }
  0x35   : > { %3044 = vmatmul.mubr.msk.bf16.gmra.mrb[16].mxu0 %vm397_vm2, %v366_v29  ;;  %v3467_v29 = vld [vmem:[%s4589_s2] ss:$0 sm:$0xff] }
  0x36   : > { %3047 = vmatprep.mubr.msk.bf16.mxu0 %vm3237_vm1, %v3236_v1  ;;  %3116 = vmatmul.mubr.msk.bf16.gmra.mrb[16].mxu1 %vm397_vm2, %v384_v34  ;;  %v3474_v34 = vld [vmem:[%s4590_s3] sm:$0xff] }
  0x37   : > { %3119 = vmatprep.mubr.msk.bf16.mxu1 %vm3237_vm1, %v3236_v1  ;;  %v3480_v44 = vrot.slane %v3474_v34, %v1283_v30  ;;  %v3483_v45 = vrot.slane %v3474_v34, %v1383_v31 }
  0x39   : > { %v1285_v60 = vmul.f32 %v3480_v44, %v1249_v48  ;;  %v1386_v12 = vmul.f32 %v3483_v45, %v1350_v61  ;;  %v3533_v48 = vrot.slane %v3474_v34, %v1885_v25 }
  0x3d   : > { %3048 = vmatmul.mubr.msk.bf16.gmra.mrb[20].mxu0 %vm397_vm2, %v367_v35 }
  0x3e   : > { %3051 = vmatprep.mubr.msk.bf16.mxu0 %vm3237_vm1, %v3236_v1  ;;  %3120 = vmatmul.mubr.msk.bf16.gmra.mrb[20].mxu1 %vm397_vm2, %v385_v40 }
  0x3f   : > { %3123 = vmatprep.mubr.msk.bf16.mxu1 %vm3237_vm1, %v3236_v1 }
  0x45   : > { %3052 = vmatmul.mubr.msk.bf16.gmra.mrb[24].mxu0 %vm397_vm2, %v368_v41 }
  0x46   : > { %3055 = vmatprep.mubr.msk.bf16.mxu0 %vm3237_vm1, %v3236_v1  ;;  %3124 = vmatmul.mubr.msk.bf16.gmra.mrb[24].mxu1 %vm397_vm2, %v386_v46  ;;  %v1483_v46 = vsub.s32 2, %v3462_v28 }
  0x47   : > { %3127 = vmatprep.mubr.msk.bf16.mxu1 %vm3237_vm1, %v3236_v1 }
  0x48   : > { %v3494_v58 = vrot.slane %v3474_v34, %v1483_v46 }
  0x4d   : > { %3056 = vmatmul.mubr.msk.bf16.gmra.mrb[28].mxu0 %vm397_vm2, %v369_v47 }
  0x4e   : > { %3059 = vmatprep.mubr.msk.bf16.mxu0 %vm3237_vm1, %v3236_v1  ;;  %3128 = vmatmul.mubr.msk.bf16.gmra.mrb[28].mxu1 %vm397_vm2, %v387_v52 }
  0x4f   : > { %3131 = vmatprep.mubr.msk.bf16.mxu1 %vm3237_vm1, %v3236_v1 }
  0x55   : > { %3060 = vmatmul.mubr.msk.bf16.gmra.mrb[32].mxu0 %vm397_vm2, %v370_v53  ;;  %v1584_v53 = vsub.s32 3, %v3462_v28 }
  0x56   : > { %3063 = vmatprep.mubr.msk.bf16.mxu0 %vm3237_vm1, %v3236_v1  ;;  %3132 = vmatmul.mubr.msk.bf16.gmra.mrb[32].mxu1 %vm397_vm2, %v388_v20  ;;  %v1450_v20 = vld [vmem:[#allocation2 + $0xa] sm:$0xff] }
  0x57   : > { %v3504_v6 = vrot.slane %v3474_v34, %v1584_v53 }
  0x5d   : > { %3064 = vmatmul.mubr.msk.bf16.gmra.mrb[36].mxu0 %vm397_vm2, %v371_v56 }
  0x5e   : > { %3067 = vmatprep.mubr.msk.bf16.mxu0 %vm3237_vm1, %v3236_v1 }
  0x65   : > { %3068 = vmatmul.mubr.msk.bf16.gmra.mrb[40].mxu0 %vm397_vm2, %v372_v59  ;;  %v1250_v59 = vld [vmem:[#allocation2 + $0x8] sm:$0xff] }
  0x66   : > { %3071 = vmatprep.mubr.msk.bf16.mxu0 %vm3237_vm1, %v3236_v1 }
  0x6d   : > { %3072 = vmatmul.mubr.msk.bf16.gmra.mrb[44].mxu0 %vm397_vm2, %v373_v62  ;;  %v1385_v62 = vmul.f32 %v3483_v45, %v1349_v49 }
  0x6e   : > { %3075 = vmatprep.mubr.msk.bf16.mxu0 %vm3237_vm1, %v3236_v1 }
  0x6f   : > { %v1417_v19 = vadd.f32 %v1385_v62, %v1285_v60 }
  0x75   : > { %3076 = vmatmul.mubr.msk.bf16.gmra.mrb[48].mxu0 %vm397_vm2, %v374_v2  ;;  %v1449_v2 = vld [vmem:[#allocation2 + $0x2] sm:$0xff] }
  0x76   : > { %3079 = vmatprep.mubr.msk.bf16.mxu0 %vm3237_vm1, %v3236_v1  ;;  %v1485_v21 = vmul.f32 %v3494_v58, %v1449_v2 }
  0x7d   : > { %3080 = vmatmul.mubr.msk.bf16.gmra.mrb[52].mxu0 %vm397_vm2, %v375_v5 }
  0x7e   : > { %3083 = vmatprep.mubr.msk.bf16.mxu0 %vm3237_vm1, %v3236_v1 }
  0x85   : > { %3084 = vmatmul.mubr.msk.bf16.gmra.mrb[56].mxu0 %vm397_vm2, %v376_v8 }
  0x86   : > { %3087 = vmatprep.mubr.msk.bf16.mxu0 %vm3237_vm1, %v3236_v1 }
  0x8d   : > { %3088 = vmatmul.mubr.msk.bf16.gmra.mrb[60].mxu0 %vm397_vm2, %v377_v11  ;;  %v1286_v11 = vmul.f32 %v3480_v44, %v1250_v59 }
  0x8e   : > { %3091 = vmatprep.mubr.msk.bf16.mxu0 %vm3237_vm1, %v3236_v1 }
  0x8f   : > { %v1418_v31 = vadd.f32 %v1386_v12, %v1286_v11 }
  0x95   : > { %3092 = vmatmul.mubr.msk.bf16.gmra.mrb[64].mxu0 %vm397_vm2, %v378_v14 }
  0x96   : > { %3095 = vmatprep.mubr.msk.bf16.mxu0 %vm3237_vm1, %v3236_v1  ;;  %v3202_v1 = vld [vmem:[%s4592_s5 + $0x8] ss:$0 sps:$4 sm:$0xff]  }
  0x97   : > { %3173 = vmatprep.subr.msk.bf16.mxu1 %vm2337_vm4, %v3202_v1  ;;  %v2339_v22 = vsel %vm2337_vm4, %v3202_v1, 0  ;;  %v1684_v1 = vsub.s32 4, %v3462_v28 }
  0x98   : > { %3138 = vmatpush3.bf16.msra.mxu1 %v2339_v22  ;;  %v1784_v22 = vsub.s32 5, %v3462_v28 }
  0x9d   : > { %3096 = vmatmul.mubr.msk.bf16.gmra.mrb[68].mxu0 %vm397_vm2, %v379_v17 }
  0xe8   : > { %v517_v23 = vpop.f32.mrb[0].mxu0 }
  0xe9   : > { %v3029_v24 = vpop.f32.mrb[1].mxu0  ;;  %v661_v32 = vpop.f32.mrb[0].mxu1 }
  0xea   : > { %v520_v26 = vpop.f32.mrb[2].mxu0  ;;  %v662_v35 = vadd.f32 %v3467_v29, %v661_v32  ;;  %v3101_v36 = vpop.f32.mrb[1].mxu1  ;;  %v1486_v32 = vmul.f32 %v3494_v58, %v1450_v20 }
  0xeb   : > { %v3030_v27 = vpop.f32.mrb[3].mxu0  ;;  %v664_v38 = vpop.f32.mrb[2].mxu1  ;;  %v1985_v26 = vsub.s32 7, %v3462_v28 }
  0xec   : > { %v768_v40 = vmax.f32 %v662_v35, 0.0  ;;  %v665_v41 = vadd.f32 %v3467_v29, %v664_v38  ;;  %v3102_v42 = vpop.f32.mrb[3].mxu1 }
  0xed   : > { %v3536_v49 = vrot.slane %v3474_v34, %v1985_v26 }
  0xee   : > { %v822_v50 = vmin.f32 %v768_v40, 6.0  ;;  %v769_v51 = vmax.f32 %v665_v41, 0.0  ;;  %v3527_v40 = vrot.slane %v3474_v34, %v1784_v22 }
  0xf0   : > { %v525_v33 = vpop.f32.mrb[4].mxu0  ;;  %v1174_v55 = vsel %vm916_vm5, %v822_v50, 0.0  ;;  %v823_v56 = vmin.f32 %v769_v51, 6.0 }
  0xf1   : > { %v3033_v37 = vpop.f32.mrb[5].mxu0  ;;  %1229 = vst.msk [vmem:[#allocation2 + $0x120] sm:$0xff] %vm1192_vm3, %v1174_v55  ;;  %v669_v63 = vpop.f32.mrb[4].mxu1 }
  0xf2   : > { %v528_v39 = vpop.f32.mrb[6].mxu0  ;;  %1230 = vst.msk [vmem:[#allocation2 + $0x128] sm:$0xff] %vm1192_vm3, %v823_v56  ;;  %v670_v3 = vadd.f32 %v3467_v29, %v669_v63  ;;  %v3105_v4 = vpop.f32.mrb[5].mxu1  ;;  %v1517_v37 = vadd.f32 %v1485_v21, %v1417_v19  ;;  %v1518_v56 = vadd.f32 %v1486_v32, %v1418_v31 }
  0xf3   : > { %v529_v43 = vadd.f32 %v3467_v29, %v528_v39  ;;  %v3034_v47 = vpop.f32.mrb[7].mxu0  ;;  %v672_v9 = vpop.f32.mrb[6].mxu1  ;;  %v3524_v39 = vrot.slane %v3474_v34, %v1684_v1 }
  0xf4   : > { %v770_v13 = vmax.f32 %v670_v3, 0.0  ;;  %v673_v14 = vadd.f32 %v3467_v29, %v672_v9  ;;  %v3106_v15 = vpop.f32.mrb[7].mxu1 }
  0xf5   : > { %v735_v52 = vmax.f32 %v529_v43, 0.0 }
  0xf6   : > { %v824_v23 = vmin.f32 %v770_v13, 6.0  ;;  %v771_v24 = vmax.f32 %v673_v14, 0.0 }
  0xf7   : > { %v789_v57 = vmin.f32 %v735_v52, 6.0 }
  0xf8   : > { %v533_v0 = vpop.f32.mrb[8].mxu0  ;;  %v1176_v33 = vsel %vm975_vm6, %v824_v23, 0.0  ;;  %v825_v35 = vmin.f32 %v771_v24, 6.0  ;;  %v1871_v61 = vld [vmem:[#allocation2 + $0x120] sm:$0xff] }
  0xf9   : > { %v1141_v5 = vsel %vm916_vm5, %v789_v57, 0.0  ;;  %v534_v7 = vadd.f32 %v3467_v29, %v533_v0  ;;  %v3037_v8 = vpop.f32.mrb[9].mxu0  ;;  %1231 = vst.msk [vmem:[#allocation2 + $0x130] sm:$0xff] %vm1192_vm3, %v1176_v33  ;;  %v677_v38 = vpop.f32.mrb[8].mxu1  ;;  %v2071_v62 = vld [vmem:[#allocation2 + $0x122] sm:$0xff]  ;;  %v3547_v4 = vmul.f32 %v3533_v48, %v1871_v61 }
  0xfa   : > { %1196 = vst.msk [vmem:[#allocation2 + $0x18] sm:$0xff] %vm1192_vm3, %v1141_v5  ;;  %v536_v10 = vpop.f32.mrb[10].mxu0  ;;  %v1177_v42 = vsel %vm916_vm5, %v825_v35, 0.0  ;;  %v678_v43 = vadd.f32 %v3467_v29, %v677_v38  ;;  %v3109_v46 = vpop.f32.mrb[9].mxu1  ;;  %v1872_v3 = vld [vmem:[#allocation2 + $0x128] sm:$0xff] }
  0xfb   : > { %v736_v16 = vmax.f32 %v534_v7, 0.0  ;;  %v537_v17 = vadd.f32 %v3467_v29, %v536_v10  ;;  %v3038_v18 = vpop.f32.mrb[11].mxu0  ;;  %1232 = vst.msk [vmem:[#allocation2 + $0x138] sm:$0xff] %vm1192_vm3, %v1177_v42  ;;  %v680_v53 = vpop.f32.mrb[10].mxu1  ;;  %v1971_v5 = vld [vmem:[#allocation2 + $0x121] sm:$0xff]  ;;  %v3550_v7 = vmul.f32 %v1871_v61, %v3504_v6  ;;  %v3558_v11 = vmul.f32 %v3533_v48, %v1872_v3 }
  0xfc   : > { %v772_v59 = vmax.f32 %v678_v43, 0.0  ;;  %v681_v60 = vadd.f32 %v3467_v29, %v680_v53  ;;  %v3110_v34 = vpop.f32.mrb[11].mxu1  ;;  %v3555_v8 = vld [vmem:[%s4590_s3 + $0x8] ss:$0 sm:$0xff]  ;;  %v3561_v12 = vmul.f32 %v3536_v49, %v1971_v5  ;;  %v3572_v22 = vmul.f32 %v1971_v5, %v3524_v39 }
  0xfd   : > { %v790_v27 = vmin.f32 %v736_v16, 6.0  ;;  %v737_v30 = vmax.f32 %v537_v17, 0.0  ;;  %v3564_v15 = vmul.f32 %v3555_v8, %v2071_v62  ;;  %v3567_v16 = vmul.f32 %v1872_v3, %v3504_v6 }
  0xfe   : > { %v826_v9 = vmin.f32 %v772_v59, 6.0  ;;  %v773_v10 = vmax.f32 %v681_v60, 0.0 }
  0xff   : > { %1197 = vst.msk [vmem:[#allocation2 + $0x20] sm:$0xff] %vm1192_vm3, %v790_v27  ;;  %v791_v36 = vmin.f32 %v737_v30, 6.0 }
 0x100   : > { %v541_v41 = vpop.f32.mrb[12].mxu0  ;;  %1233 = vst.msk [vmem:[#allocation2 + $0x140] sm:$0xff] %vm1192_vm3, %v826_v9  ;;  %v827_v1 = vmin.f32 %v773_v10, 6.0 }
 0x101   : > { %v1251_v47 = vld [vmem:[#allocation2 + $0x18] sm:$0xff]  ;;  %v1143_v50 = vsel %vm975_vm6, %v791_v36, 0.0  ;;  %v542_v51 = vadd.f32 %v3467_v29, %v541_v41  ;;  %v3041_v52 = vpop.f32.mrb[13].mxu0  ;;  %v685_v27 = vpop.f32.mrb[12].mxu1 }
 0x102   : > { %1198 = vst.msk [vmem:[#allocation2 + $0x28] sm:$0xff] %vm1192_vm3, %v1143_v50  ;;  %v544_v55 = vpop.f32.mrb[14].mxu0  ;;  %v1586_v57 = vmul.f32 %v3504_v6, %v1251_v47  ;;  %v1287_v17 = vmul.f32 %v3480_v44, %v1251_v47  ;;  %v3113_v36 = vpop.f32.mrb[13].mxu1  ;;  %v1179_v46 = vsel %vm975_vm6, %v827_v1, 0.0  ;;  %v686_v47 = vadd.f32 %v3467_v29, %v685_v27 }
 0x103   : > { %v738_v63 = vmax.f32 %v542_v51, 0.0  ;;  %v545_v0 = vadd.f32 %v3467_v29, %v544_v55  ;;  %v3042_v2 = vpop.f32.mrb[15].mxu0  ;;  %v688_v50 = vpop.f32.mrb[14].mxu1  ;;  %1234 = vst.msk [vmem:[#allocation2 + $0x148] sm:$0xff] %vm1192_vm3, %v1179_v46 }
 0x104   : > { %v1618_v21 = vadd.f32 %v1586_v57, %v1517_v37  ;;  %v3114_v59 = vpop.f32.mrb[15].mxu1 }
 0x105   : > { %v792_v13 = vmin.f32 %v738_v63, 6.0  ;;  %v739_v14 = vmax.f32 %v545_v0, 0.0  ;;  %v2072_v0 = vld [vmem:[#allocation2 + $0x12a] sm:$0xff] }
 0x106   : > { %v1252_v18 = vld [vmem:[#allocation2 + $0x20] sm:$0xff] }
 0x107   : > { %v1351_v19 = vld [vmem:[#allocation2 + $0x19] sm:$0xff]  ;;  %v1288_v23 = vmul.f32 %v3480_v44, %v1252_v18  ;;  %v1144_v25 = vsel %vm916_vm5, %v792_v13, 0.0  ;;  %v793_v26 = vmin.f32 %v739_v14, 6.0  ;;  %v1587_v31 = vmul.f32 %v3504_v6, %v1252_v18 }
 0x108   : > { %v1451_v20 = vld [vmem:[#allocation2 + $0x1a] sm:$0xff]  ;;  %v1387_v24 = vmul.f32 %v3483_v45, %v1351_v19  ;;  %1199 = vst.msk [vmem:[#allocation2 + $0x30] sm:$0xff] %vm1192_vm3, %v1144_v25  ;;  %v549_v30 = vpop.f32.mrb[16].mxu0  ;;  %v1686_v32 = vmul.f32 %v3524_v39, %v1351_v19  ;;  %v774_v13 = vmax.f32 %v686_v47, 0.0  ;;  %v689_v14 = vadd.f32 %v3467_v29, %v688_v50 }
 0x109   : > { %v1786_v33 = vmul.f32 %v3527_v40, %v1451_v20  ;;  %v1487_v35 = vmul.f32 %v3494_v58, %v1451_v20  ;;  %v1352_v37 = vld [vmem:[#allocation2 + $0x21] sm:$0xff]  ;;  %1200 = vst.msk [vmem:[#allocation2 + $0x38] sm:$0xff] %vm1192_vm3, %v793_v26  ;;  %v550_v41 = vadd.f32 %v3467_v29, %v549_v30  ;;  %v3045_v42 = vpop.f32.mrb[17].mxu0  ;;  %v1619_v53 = vadd.f32 %v1587_v31, %v1518_v56  ;;  %v693_v27 = vpop.f32.mrb[16].mxu1 }
 0x10a   : > { %v1452_v38 = vld [vmem:[#allocation2 + $0x22] sm:$0xff]  ;;  %v1419_v43 = vadd.f32 %v1387_v24, %v1287_v17  ;;  %v1388_v51 = vmul.f32 %v3483_v45, %v1352_v37  ;;  %v552_v52 = vpop.f32.mrb[18].mxu0  ;;  %v1687_v55 = vmul.f32 %v3524_v39, %v1352_v37  ;;  %v1718_v57 = vadd.f32 %v1686_v32, %v1618_v21 }
 0x10b   : > { %v740_v60 = vmax.f32 %v550_v41, 0.0  ;;  %v553_v34 = vadd.f32 %v3467_v29, %v552_v52  ;;  %v3046_v61 = vpop.f32.mrb[19].mxu0  ;;  %v1787_v62 = vmul.f32 %v3527_v40, %v1452_v38  ;;  %v1488_v63 = vmul.f32 %v3494_v58, %v1452_v38  ;;  %v1972_v17 = vld [vmem:[#allocation2 + $0x129] sm:$0xff]  ;;  %v3117_v41 = vpop.f32.mrb[17].mxu1 }
 0x10c   : > { %v1719_v2 = vadd.f32 %v1687_v55, %v1619_v53  ;;  %v1818_v3 = vadd.f32 %v1786_v33, %v1718_v57  ;;  %v1420_v5 = vadd.f32 %v1388_v51, %v1288_v23  ;;  %v1519_v9 = vadd.f32 %v1487_v35, %v1419_v43  ;;  %v3615_v51 = vpop.f32.mrb[18].mxu1 }
 0x10d   : > { %v794_v56 = vmin.f32 %v740_v60, 6.0  ;;  %v741_v10 = vmax.f32 %v553_v34, 0.0  ;;  %v3596_v20 = vmul.f32 %v3536_v49, %v1972_v17  ;;  %v3599_v21 = vmul.f32 %v3555_v8, %v2072_v0  ;;  %v3118_v60 = vpop.f32.mrb[19].mxu1 }
 0x10e   : > { %v1819_v18 = vadd.f32 %v1787_v62, %v1719_v2  ;;  %v1520_v19 = vadd.f32 %v1488_v63, %v1420_v5  ;;  %v828_v25 = vmin.f32 %v774_v13, 6.0  ;;  %v775_v26 = vmax.f32 %v689_v14, 0.0 }
 0x10f   : > { %v1146_v1 = vsel %vm975_vm6, %v794_v56, 0.0  ;;  %v795_v24 = vmin.f32 %v741_v10, 6.0  ;;  %v1851_v23 = vld [vmem:[#allocation2 + $0x30] sm:$0xff]  ;;  %v3608_v38 = vadd.f32 %v3467_v29, %v693_v27 }
 0x110   : > { %1201 = vst.msk [vmem:[#allocation2 + $0x40] sm:$0xff] %vm1192_vm3, %v1146_v1  ;;  %v557_v30 = vpop.f32.mrb[20].mxu0  ;;  %v1852_v31 = vld [vmem:[#allocation2 + $0x38] sm:$0xff]  ;;  %v1887_v32 = vmul.f32 %v3533_v48, %v1851_v23  ;;  %v1588_v36 = vmul.f32 %v1851_v23, %v3504_v6  ;;  %v1289_v37 = vmul.f32 %v1851_v23, %v3480_v44 }
 0x111   : > { %v1951_v33 = vld [vmem:[#allocation2 + $0x31] sm:$0xff]  ;;  %v1147_v42 = vsel %vm916_vm5, %v795_v24, 0.0  ;;  %v558_v43 = vadd.f32 %v3467_v29, %v557_v30  ;;  %v3049_v46 = vpop.f32.mrb[21].mxu0  ;;  %v1888_v47 = vmul.f32 %v3533_v48, %v1852_v31  ;;  %v1589_v57 = vmul.f32 %v1852_v31, %v3504_v6  ;;  %v3636_v41 = vpop.f32.mrb[20].mxu1 }
 0x112   : > { %v2051_v35 = vld [vmem:[#allocation2 + $0x32] sm:$0xff]  ;;  %v1987_v50 = vmul.f32 %v3536_v49, %v1951_v33  ;;  %1202 = vst.msk [vmem:[#allocation2 + $0x48] sm:$0xff] %vm1192_vm3, %v1147_v42  ;;  %v560_v52 = vpop.f32.mrb[22].mxu0  ;;  %v1919_v53 = vadd.f32 %v1887_v32, %v1818_v3  ;;  %v1620_v59 = vadd.f32 %v1588_v36, %v1519_v9  ;;  %v1688_v0 = vmul.f32 %v1951_v33, %v3524_v39  ;;  %v3627_v9 = vld [vmem:[%s4591_s4] ss:$0 sm:$0xff] }
 0x113   : > { %v2087_v55 = vmul.f32 %v3555_v8, %v2051_v35  ;;  %v742_v34 = vmax.f32 %v558_v43, 0.0  ;;  %v561_v61 = vadd.f32 %v3467_v29, %v560_v52  ;;  %v3050_v62 = vpop.f32.mrb[23].mxu0  ;;  %v1920_v63 = vadd.f32 %v1888_v47, %v1819_v18  ;;  %v3121_v43 = vpop.f32.mrb[21].mxu1 }
 0x114   : > { %v2019_v2 = vadd.f32 %v1987_v50, %v1919_v53  ;;  %v1621_v5 = vadd.f32 %v1589_v57, %v1520_v19  ;;  %v1788_v56 = vmul.f32 %v2051_v35, %v3527_v40  ;;  %v1290_v10 = vmul.f32 %v1852_v31, %v3480_v44  ;;  %v3648_v53 = vpop.f32.mrb[22].mxu1 }
 0x115   : > { %v796_v3 = vmin.f32 %v742_v34, 6.0  ;;  %v743_v13 = vmax.f32 %v561_v61, 0.0  ;;  %v1720_v14 = vadd.f32 %v1688_v0, %v1620_v59  ;;  %v1389_v17 = vmul.f32 %v1951_v33, %v3483_v45  ;;  %v3122_v61 = vpop.f32.mrb[23].mxu1 }
 0x116   : > { %v2119_v1 = vadd.f32 %v2087_v55, %v2019_v2  ;;  %v1489_v18 = vmul.f32 %v2051_v35, %v3494_v58  ;;  %v1180_v19 = vsel %vm916_vm5, %v828_v25, 0.0  ;;  %v829_v24 = vmin.f32 %v775_v26, 6.0 }
 0x117   : > { %1203 = vst.msk [vmem:[#allocation2 + $0x50] sm:$0xff] %vm1192_vm3, %v796_v3  ;;  %v797_v23 = vmin.f32 %v743_v13, 6.0  ;;  %v1952_v27 = vld [vmem:[#allocation2 + $0x39] sm:$0xff]  ;;  %v1820_v31 = vadd.f32 %v1788_v56, %v1720_v14  ;;  %v1421_v32 = vadd.f32 %v1389_v17, %v1289_v37  ;;  %1235 = vst.msk [vmem:[#allocation2 + $0x150] sm:$0xff] %vm1192_vm3, %v1180_v19  ;;  %v776_v36 = vmax.f32 %v3608_v38, 0.0 }
 0x118   : > { %v2052_v30 = vld [vmem:[#allocation2 + $0x3a] sm:$0xff]  ;;  %v565_v33 = vpop.f32.mrb[24].mxu0  ;;  %v1988_v35 = vmul.f32 %v3536_v49, %v1952_v27  ;;  %v2158_v25 = vadd.f32 %v3627_v9, %v2119_v1  ;;  %v1689_v26 = vmul.f32 %v1952_v27, %v3524_v39  ;;  %1236 = vst.msk [vmem:[#allocation2 + $0x158] sm:$0xff] %vm1192_vm3, %v829_v24  ;;  %v1390_v52 = vmul.f32 %v1952_v27, %v3483_v45 }
 0x119   : > { %v2088_v42 = vmul.f32 %v3555_v8, %v2052_v30  ;;  %v1149_v37 = vsel %vm975_vm6, %v797_v23, 0.0  ;;  %v566_v46 = vadd.f32 %v3467_v29, %v565_v33  ;;  %v3053_v38 = vpop.f32.mrb[25].mxu0  ;;  %v1789_v47 = vmul.f32 %v2052_v30, %v3527_v40  ;;  %v1853_v50 = vld [vmem:[#allocation2 + $0x48] sm:$0xff] }
 0x11a   : > { %1204 = vst.msk [vmem:[#allocation2 + $0x58] sm:$0xff] %vm1192_vm3, %v1149_v37  ;;  %v568_v55 = vpop.f32.mrb[26].mxu0  ;;  %v2020_v57 = vadd.f32 %v1988_v35, %v1920_v63  ;;  %v2190_v59 = vmax.f32 %v2158_v25, 0.0  ;;  %v1721_v60 = vadd.f32 %v1689_v26, %v1621_v5  ;;  %v1889_v34 = vmul.f32 %v3533_v48, %v1853_v50  ;;  %v3667_v26 = vpop.f32.mrb[24].mxu1 }
 0x11b   : > { %v744_v62 = vmax.f32 %v566_v46, 0.0  ;;  %v569_v0 = vadd.f32 %v3467_v29, %v568_v55  ;;  %v3054_v2 = vpop.f32.mrb[27].mxu0  ;;  %v1422_v56 = vadd.f32 %v1390_v52, %v1290_v10  ;;  %v1490_v3 = vmul.f32 %v2052_v30, %v3494_v58 }
 0x11c   : > { %v2120_v13 = vadd.f32 %v2088_v42, %v2020_v57  ;;  %v2222_v14 = vmin.f32 %v2190_v59, 6.0  ;;  %v1821_v17 = vadd.f32 %v1789_v47, %v1721_v60  ;;  %v1921_v1 = vadd.f32 %v1889_v34, %v1820_v31  ;;  %v3125_v47 = vpop.f32.mrb[25].mxu1 }
 0x11d   : > { %v798_v19 = vmin.f32 %v744_v62, 6.0  ;;  %v745_v24 = vmax.f32 %v569_v0, 0.0  ;;  %v1521_v23 = vadd.f32 %v1489_v18, %v1421_v32  ;;  %v1522_v63 = vadd.f32 %v1490_v3, %v1422_v56  ;;  %v3678_v61 = vpop.f32.mrb[26].mxu1 }
 0x11e   : > { %v2159_v5 = vadd.f32 %v3627_v9, %v2120_v13  ;;  %v1854_v27 = vld [vmem:[#allocation2 + $0x50] sm:$0xff]  ;;  %v1590_v25 = vmul.f32 %v1853_v50, %v3504_v6  ;;  %v3659_v10 = vmul.f32 %v1853_v50, %v3480_v44  ;;  %v3661_v30 = vmin.f32 %v776_v36, 6.0  ;;  %v3126_v13 = vpop.f32.mrb[27].mxu1 }
 0x11f   : > { %v1953_v33 = vld [vmem:[#allocation2 + $0x49] sm:$0xff]  ;;  %v1150_v31 = vsel %vm916_vm5, %v798_v19, 0.0  ;;  %v799_v42 = vmin.f32 %v745_v24, 6.0  ;;  %v1890_v18 = vmul.f32 %v3533_v48, %v1854_v27  ;;  %v1591_v36 = vmul.f32 %v1854_v27, %v3504_v6 }
 0x120   : > { %v3655_v35 = vld [vmem:[#allocation2 + $0x4a] sm:$0xff]  ;;  %v1989_v32 = vmul.f32 %v3536_v49, %v1953_v33  ;;  %1205 = vst.msk [vmem:[#allocation2 + $0x60] sm:$0xff] %vm1192_vm3, %v1150_v31  ;;  %v573_v43 = vpop.f32.mrb[28].mxu0  ;;  %v2191_v37 = vmax.f32 %v2159_v5, 0.0  ;;  %v1622_v38 = vadd.f32 %v1590_v25, %v1521_v23  ;;  %v1690_v34 = vmul.f32 %v1953_v33, %v3524_v39 }
 0x121   : > { %v2089_v46 = vmul.f32 %v3555_v8, %v3655_v35  ;;  %1206 = vst.msk [vmem:[#allocation2 + $0x68] sm:$0xff] %vm1192_vm3, %v799_v42  ;;  %v574_v50 = vadd.f32 %v3467_v29, %v573_v43  ;;  %v3057_v52 = vpop.f32.mrb[29].mxu0  ;;  %v1922_v55 = vadd.f32 %v1890_v18, %v1821_v17  ;;  %v1954_v57 = vld [vmem:[#allocation2 + $0x51] sm:$0xff]  ;;  %v1623_v3 = vadd.f32 %v1591_v36, %v1522_v63 }
 0x122   : > { %v2021_v59 = vadd.f32 %v1989_v32, %v1921_v1  ;;  %v3675_v60 = vld [vmem:[#allocation2 + $0x52] sm:$0xff]  ;;  %v576_v62 = vpop.f32.mrb[30].mxu0  ;;  %v2223_v0 = vmin.f32 %v2191_v37, 6.0  ;;  %v1990_v2 = vmul.f32 %v3536_v49, %v1954_v57  ;;  %v1691_v23 = vmul.f32 %v1954_v57, %v3524_v39 }
 0x123   : > { %v2090_v56 = vmul.f32 %v3555_v8, %v3675_v60  ;;  %v746_v19 = vmax.f32 %v574_v50, 0.0  ;;  %v577_v17 = vadd.f32 %v3467_v29, %v576_v62  ;;  %v3058_v24 = vpop.f32.mrb[31].mxu0  ;;  %v1722_v31 = vadd.f32 %v1690_v34, %v1622_v38 }
 0x124   : > { %v2121_v1 = vadd.f32 %v2089_v46, %v2021_v59  ;;  %v2254_v5 = vpack.c.bf16 %v2223_v0, %v2222_v14  ;;  %v2022_v25 = vadd.f32 %v1990_v2, %v1922_v55  ;;  %v1790_v42 = vmul.f32 %v3655_v35, %v3527_v40  ;;  %v3697_v59 = vpop.f32.mrb[28].mxu1 }
 0x125   : > { %v800_v18 = vmin.f32 %v746_v19, 6.0  ;;  %v747_v32 = vmax.f32 %v577_v17, 0.0  ;;  %v1723_v37 = vadd.f32 %v1691_v23, %v1623_v3  ;;  %v1791_v36 = vmul.f32 %v3675_v60, %v3527_v40 }
 0x126   : > { %v2160_v43 = vadd.f32 %v3627_v9, %v2121_v1  ;;  %3139 = vmatprep.mubr.msk.bf16.mxu1 %vm1192_vm3, %v2254_v5  ;;  %v2122_v63 = vadd.f32 %v2090_v56, %v2022_v25  ;;  %v1822_v46 = vadd.f32 %v1790_v42, %v1722_v31  ;;  %v1292_v47 = vmul.f32 %v1854_v27, %v3480_v44 }
 0x127   : > { %v1152_v14 = vsel %vm975_vm6, %v800_v18, 0.0  ;;  %v801_v38 = vmin.f32 %v747_v32, 6.0  ;;  %v3694_v52 = vld [vmem:[#allocation2 + $0x60] sm:$0xff]  ;;  %v1391_v55 = vmul.f32 %v1953_v33, %v3483_v45  ;;  %v1823_v0 = vadd.f32 %v1791_v36, %v1723_v37  ;;  %v3129_v33 = vpop.f32.mrb[29].mxu1 }
 0x128   : > { %v2192_v50 = vmax.f32 %v2160_v43, 0.0  ;;  %1207 = vst.msk [vmem:[#allocation2 + $0x70] sm:$0xff] %vm1192_vm3, %v1152_v14  ;;  %v581_v34 = vpop.f32.mrb[32].mxu0  ;;  %v2161_v62 = vadd.f32 %v3627_v9, %v2122_v63  ;;  %v3701_v2 = vld [vmem:[#allocation2 + $0x68] sm:$0xff]  ;;  %v1891_v27 = vmul.f32 %v3533_v48, %v3694_v52  ;;  %v1392_v13 = vmul.f32 %v1954_v57, %v3483_v45  ;;  %v720_v5 = vpop.f32.mrb[30].mxu1 }
 0x129   : > { %v3705_v56 = vld [vmem:[#allocation2 + $0x61] sm:$0xff]  ;;  %v1153_v19 = vsel %vm916_vm5, %v801_v38, 0.0  ;;  %v582_v17 = vadd.f32 %v3467_v29, %v581_v34  ;;  %v3061_v24 = vpop.f32.mrb[33].mxu0  ;;  %v1892_v23 = vmul.f32 %v3533_v48, %v3701_v2  ;;  %v3130_v32 = vpop.f32.mrb[31].mxu1  ;;  %v1423_v14 = vadd.f32 %v1391_v55, %v3659_v10 }
 0x12a   : > { %v3707_v3 = vld [vmem:[#allocation2 + $0x62] sm:$0xff]  ;;  %v2224_v1 = vmin.f32 %v2192_v50, 6.0  ;;  %1208 = vst.msk [vmem:[#allocation2 + $0x78] sm:$0xff] %vm1192_vm3, %v1153_v19  ;;  %v584_v25 = vpop.f32.mrb[34].mxu0  ;;  %v2193_v31 = vmax.f32 %v2161_v62, 0.0  ;;  %v1923_v42 = vadd.f32 %v1891_v27, %v1822_v46  ;;  %v1991_v57 = vmul.f32 %v3536_v49, %v3705_v56 }
 0x12b   : > { %v2091_v18 = vmul.f32 %v3555_v8, %v3707_v3  ;;  %v748_v43 = vmax.f32 %v582_v17, 0.0  ;;  %v585_v37 = vadd.f32 %v3467_v29, %v584_v25  ;;  %v3062_v63 = vpop.f32.mrb[35].mxu0  ;;  %v1924_v36 = vadd.f32 %v1892_v23, %v1823_v0 }
 0x12c   : > { %v2225_v38 = vmin.f32 %v2193_v31, 6.0  ;;  %v2023_v50 = vadd.f32 %v1991_v57, %v1923_v42  ;;  %v1424_v34 = vadd.f32 %v1392_v13, %v1292_v47  ;;  %v1491_v46 = vmul.f32 %v3655_v35, %v3494_v58 }
 0x12d   : > { %v802_v62 = vmin.f32 %v748_v43, 6.0  ;;  %v749_v27 = vmax.f32 %v585_v37, 0.0  ;;  %v1492_v33 = vmul.f32 %v3675_v60, %v3494_v58  ;;  %v1592_v19 = vmul.f32 %v3694_v52, %v3504_v6 }
 0x12e   : > { %v2255_v17 = vpack.c.bf16 %v2225_v38, %v2224_v1  ;;  %v2123_v24 = vadd.f32 %v2091_v18, %v2023_v50  ;;  %v1523_v5 = vadd.f32 %v1491_v46, %v1423_v14  ;;  %v1593_v10 = vmul.f32 %v3701_v2, %v3504_v6 }
 0x12f   : > { %1209 = vst.msk [vmem:[#allocation2 + $0x80] sm:$0xff] %vm1192_vm3, %v802_v62  ;;  %v803_v47 = vmin.f32 %v749_v27, 6.0  ;;  %v1956_v55 = vld [vmem:[#allocation2 + $0x69] sm:$0xff]  ;;  %v1524_v35 = vadd.f32 %v1492_v33, %v1424_v34  ;;  %v1692_v13 = vmul.f32 %v3705_v56, %v3524_v39  ;;  %v1792_v60 = vmul.f32 %v3707_v3, %v3527_v40 }
 0x130   : > { %v3731_v0 = vld [vmem:[#allocation2 + $0x6a] sm:$0xff]  ;;  %v589_v23 = vpop.f32.mrb[36].mxu0  ;;  %3140 = vmatmul.mubr.msk.bf16.vlgmr.msra.gmra.mrb[36].mxu1 %vm1192_vm3, %v2255_v17  ;;  %v1992_v1 = vmul.f32 %v3536_v49, %v1956_v55  ;;  %v2162_v31 = vadd.f32 %v3627_v9, %v2123_v24  ;;  %v1624_v42 = vadd.f32 %v1592_v19, %v1523_v5  ;;  %v1693_v37 = vmul.f32 %v1956_v55, %v3524_v39 }
 0x131   : > { %v2092_v25 = vmul.f32 %v3555_v8, %v3731_v0  ;;  %v1155_v57 = vsel %vm975_vm6, %v803_v47, 0.0  ;;  %v590_v18 = vadd.f32 %v3467_v29, %v589_v23  ;;  %v3065_v32 = vpop.f32.mrb[37].mxu0  ;;  %v1625_v43 = vadd.f32 %v1593_v10, %v1524_v35  ;;  %v3746_v63 = vld [vmem:[#allocation2 + $0x78] sm:$0xff] }
 0x132   : > { %1210 = vst.msk [vmem:[#allocation2 + $0x88] sm:$0xff] %vm1192_vm3, %v1155_v57  ;;  %v592_v14 = vpop.f32.mrb[38].mxu0  ;;  %v2024_v38 = vadd.f32 %v1992_v1, %v1924_v36  ;;  %v2194_v50 = vmax.f32 %v2162_v31, 0.0  ;;  %v1724_v34 = vadd.f32 %v1692_v13, %v1624_v42  ;;  %v1793_v46 = vmul.f32 %v3731_v0, %v3527_v40 }
 0x133   : > { %v750_v62 = vmax.f32 %v590_v18, 0.0  ;;  %v593_v27 = vadd.f32 %v3467_v29, %v592_v14  ;;  %v3066_v33 = vpop.f32.mrb[39].mxu0  ;;  %v1725_v19 = vadd.f32 %v1693_v37, %v1625_v43  ;;  %v1893_v17 = vmul.f32 %v3533_v48, %v3746_v63 }
 0x134   : > { %v2124_v24 = vadd.f32 %v2092_v25, %v2024_v38  ;;  %v2226_v5 = vmin.f32 %v2194_v50, 6.0  ;;  %v1824_v10 = vadd.f32 %v1792_v60, %v1724_v34  ;;  %v1293_v47 = vmul.f32 %v3694_v52, %v3480_v44 }
 0x135   : > { %v804_v36 = vmin.f32 %v750_v62, 6.0  ;;  %v751_v35 = vmax.f32 %v593_v27, 0.0  ;;  %v1825_v13 = vadd.f32 %v1793_v46, %v1725_v19  ;;  %v1294_v23 = vmul.f32 %v3701_v2, %v3480_v44 }
 0x136   : > { %v2163_v1 = vadd.f32 %v3627_v9, %v2124_v24  ;;  %v3759_v31 = vld [vmem:[#allocation2 + $0x80] sm:$0xff]  ;;  %v1925_v42 = vadd.f32 %v1893_v17, %v1824_v10  ;;  %v1393_v60 = vmul.f32 %v3705_v56, %v3483_v45  ;;  %v1394_v52 = vmul.f32 %v1956_v55, %v3483_v45 }
 0x137   : > { %v3761_v57 = vld [vmem:[#allocation2 + $0x79] sm:$0xff]  ;;  %v1156_v25 = vsel %vm916_vm5, %v804_v36, 0.0  ;;  %v805_v32 = vmin.f32 %v751_v35, 6.0  ;;  %v1894_v2 = vmul.f32 %v3533_v48, %v3759_v31  ;;  %v1493_v19 = vmul.f32 %v3707_v3, %v3494_v58 }
 0x138   : > { %v3763_v18 = vld [vmem:[#allocation2 + $0x7a] sm:$0xff]  ;;  %v1993_v43 = vmul.f32 %v3536_v49, %v3761_v57  ;;  %1211 = vst.msk [vmem:[#allocation2 + $0x90] sm:$0xff] %vm1192_vm3, %v1156_v25  ;;  %v597_v37 = vpop.f32.mrb[40].mxu0  ;;  %v2195_v14 = vmax.f32 %v2163_v1, 0.0  ;;  %v1425_v56 = vadd.f32 %v1393_v60, %v1293_v47  ;;  %v1426_v50 = vadd.f32 %v1394_v52, %v1294_v23 }
 0x139   : > { %v2093_v38 = vmul.f32 %v3555_v8, %v3763_v18  ;;  %1212 = vst.msk [vmem:[#allocation2 + $0x98] sm:$0xff] %vm1192_vm3, %v805_v32  ;;  %v598_v55 = vadd.f32 %v3467_v29, %v597_v37  ;;  %v3069_v34 = vpop.f32.mrb[41].mxu0  ;;  %v1926_v46 = vadd.f32 %v1894_v2, %v1825_v13  ;;  %v3779_v62 = vld [vmem:[#allocation2 + $0x81] sm:$0xff]  ;;  %v1494_v36 = vmul.f32 %v3731_v0, %v3494_v58 }
 0x13a   : > { %v2025_v27 = vadd.f32 %v1993_v43, %v1925_v42  ;;  %v3781_v33 = vld [vmem:[#allocation2 + $0x82] sm:$0xff]  ;;  %v600_v17 = vpop.f32.mrb[42].mxu0  ;;  %v2227_v24 = vmin.f32 %v2195_v14, 6.0  ;;  %v1994_v10 = vmul.f32 %v3536_v49, %v3779_v62  ;;  %v1525_v42 = vadd.f32 %v1493_v19, %v1425_v56 }
 0x13b   : > { %v2094_v47 = vmul.f32 %v3555_v8, %v3781_v33  ;;  %v752_v35 = vmax.f32 %v598_v55, 0.0  ;;  %v601_v13 = vadd.f32 %v3467_v29, %v600_v17  ;;  %v3070_v23 = vpop.f32.mrb[43].mxu0  ;;  %v1526_v3 = vadd.f32 %v1494_v36, %v1426_v50 }
 0x13c   : > { %v2125_v1 = vadd.f32 %v2093_v38, %v2025_v27  ;;  %v2256_v60 = vpack.c.bf16 %v2227_v24, %v2226_v5  ;;  %v2026_v52 = vadd.f32 %v1994_v10, %v1926_v46  ;;  %v1594_v25 = vmul.f32 %v3746_v63, %v3504_v6 }
 0x13d   : > { %v806_v32 = vmin.f32 %v752_v35, 6.0  ;;  %v753_v2 = vmax.f32 %v601_v13, 0.0  ;;  %v1595_v37 = vmul.f32 %v3759_v31, %v3504_v6  ;;  %v1694_v38 = vmul.f32 %v3761_v57, %v3524_v39 }
 0x13e   : > { %v2164_v43 = vadd.f32 %v3627_v9, %v2125_v1  ;;  %3143 = vmatprep.mubr.msk.bf16.mxu1 %vm1192_vm3, %v2256_v60  ;;  %v2126_v0 = vadd.f32 %v2094_v47, %v2026_v52  ;;  %v1626_v14 = vadd.f32 %v1594_v25, %v1525_v42  ;;  %v1695_v5 = vmul.f32 %v3779_v62, %v3524_v39 }
 0x13f   : > { %v1158_v56 = vsel %vm975_vm6, %v806_v32, 0.0  ;;  %v807_v50 = vmin.f32 %v753_v2, 6.0  ;;  %v1627_v34 = vadd.f32 %v1595_v37, %v1526_v3  ;;  %v3804_v46 = vld [vmem:[#allocation2 + $0x90] sm:$0xff]  ;;  %v1794_v24 = vmul.f32 %v3763_v18, %v3527_v40 }
 0x140   : > { %v2196_v55 = vmax.f32 %v2164_v43, 0.0  ;;  %1213 = vst.msk [vmem:[#allocation2 + $0xa0] sm:$0xff] %vm1192_vm3, %v1158_v56  ;;  %v605_v27 = vpop.f32.mrb[44].mxu0  ;;  %v2165_v19 = vadd.f32 %v3627_v9, %v2126_v0  ;;  %v1726_v17 = vadd.f32 %v1694_v38, %v1626_v14  ;;  %v1795_v10 = vmul.f32 %v3781_v33, %v3527_v40  ;;  %v3812_v47 = vld [vmem:[#allocation2 + $0x98] sm:$0xff] }
 0x141   : > { %v3814_v36 = vld [vmem:[#allocation2 + $0x91] sm:$0xff]  ;;  %v1159_v35 = vsel %vm916_vm5, %v807_v50, 0.0  ;;  %v606_v13 = vadd.f32 %v3467_v29, %v605_v27  ;;  %v3073_v23 = vpop.f32.mrb[45].mxu0  ;;  %v1727_v42 = vadd.f32 %v1695_v5, %v1627_v34  ;;  %v1895_v32 = vmul.f32 %v3533_v48, %v3804_v46 }
 0x142   : > { %v2228_v1 = vmin.f32 %v2196_v55, 6.0  ;;  %v3819_v60 = vld [vmem:[#allocation2 + $0x92] sm:$0xff]  ;;  %1214 = vst.msk [vmem:[#allocation2 + $0xa8] sm:$0xff] %vm1192_vm3, %v1159_v35  ;;  %v608_v52 = vpop.f32.mrb[46].mxu0  ;;  %v2197_v3 = vmax.f32 %v2165_v19, 0.0  ;;  %v1826_v25 = vadd.f32 %v1794_v24, %v1726_v17  ;;  %v1896_v2 = vmul.f32 %v3533_v48, %v3812_v47 }
 0x143   : > { %v754_v43 = vmax.f32 %v606_v13, 0.0  ;;  %v609_v37 = vadd.f32 %v3467_v29, %v608_v52  ;;  %v3074_v0 = vpop.f32.mrb[47].mxu0  ;;  %v1827_v14 = vadd.f32 %v1795_v10, %v1727_v42  ;;  %v1995_v38 = vmul.f32 %v3536_v49, %v3814_v36 }
 0x144   : > { %v2229_v5 = vmin.f32 %v2197_v3, 6.0  ;;  %v1927_v56 = vadd.f32 %v1895_v32, %v1826_v25  ;;  %v2095_v50 = vmul.f32 %v3555_v8, %v3819_v60  ;;  %v1182_v55 = vsel %vm975_vm6, %v3661_v30, 0.0 }
 0x145   : > { %v808_v34 = vmin.f32 %v754_v43, 6.0  ;;  %v755_v27 = vmax.f32 %v609_v37, 0.0  ;;  %v1928_v19 = vadd.f32 %v1896_v2, %v1827_v14  ;;  %1237 = vst.msk [vmem:[#allocation2 + $0x160] sm:$0xff] %vm1192_vm3, %v1182_v55  ;;  %v697_v17 = vadd.f32 %v3467_v29, %v3615_v51  ;;  %v3865_v55 = vld [vmem:[%s4589_s2] ss:$0 sm:$0xff] }
 0x146   : > { %v2257_v24 = vpack.c.bf16 %v2229_v5, %v2228_v1  ;;  %v2027_v10 = vadd.f32 %v1995_v38, %v1927_v56  ;;  %v702_v35 = vadd.f32 %v3467_v29, %v3636_v41  ;;  %v1295_v13 = vmul.f32 %v3746_v63, %v3480_v44 }
 0x147   : > { %1215 = vst.msk [vmem:[#allocation2 + $0xb0] sm:$0xff] %vm1192_vm3, %v808_v34  ;;  %v809_v23 = vmin.f32 %v755_v27, 6.0  ;;  %v3842_v30 = vld [vmem:[#allocation2 + $0x99] sm:$0xff]  ;;  %v777_v52 = vmax.f32 %v697_v17, 0.0  ;;  %v1296_v3 = vmul.f32 %v3759_v31, %v3480_v44  ;;  %v1395_v51 = vmul.f32 %v3761_v57, %v3483_v45 }
 0x148   : > { %v3844_v42 = vld [vmem:[#allocation2 + $0x9a] sm:$0xff]  ;;  %v613_v1 = vpop.f32.mrb[48].mxu0  ;;  %3144 = vmatmul.mubr.msk.bf16.gmra.mrb[40].mxu1 %vm1192_vm3, %v2257_v24  ;;  %v1996_v41 = vmul.f32 %v3536_v49, %v3842_v30  ;;  %v2127_v25 = vadd.f32 %v2095_v50, %v2027_v10  ;;  %v778_v32 = vmax.f32 %v702_v35, 0.0  ;;  %v1396_v57 = vmul.f32 %v3779_v62, %v3483_v45 }
 0x149   : > { %v2096_v63 = vmul.f32 %v3555_v8, %v3844_v42  ;;  %v1161_v2 = vsel %vm975_vm6, %v809_v23, 0.0  ;;  %v614_v43 = vadd.f32 %v3467_v29, %v613_v1  ;;  %v3077_v31 = vpop.f32.mrb[49].mxu0  ;;  %v831_v37 = vmin.f32 %v777_v52, 6.0 }
 0x14a   : > { %1216 = vst.msk [vmem:[#allocation2 + $0xb8] sm:$0xff] %vm1192_vm3, %v1161_v2  ;;  %v616_v0 = vpop.f32.mrb[50].mxu0  ;;  %v2028_v14 = vadd.f32 %v1996_v41, %v1928_v19  ;;  %v2166_v38 = vadd.f32 %v3627_v9, %v2127_v25  ;;  %v832_v5 = vmin.f32 %v778_v32, 6.0  ;;  %v1427_v56 = vadd.f32 %v1395_v51, %v1295_v13 }
 0x14b   : > { %v756_v50 = vmax.f32 %v614_v43, 0.0  ;;  %v617_v29 = vadd.f32 %v3865_v55, %v616_v0  ;;  %v3078_v34 = vpop.f32.mrb[51].mxu0  ;;  %v1183_v62 = vsel %vm916_vm5, %v831_v37, 0.0  ;;  %v1428_v27 = vadd.f32 %v1396_v57, %v1296_v3 }
 0x14c   : > { %v2128_v17 = vadd.f32 %v2096_v63, %v2028_v14  ;;  %v2198_v24 = vmax.f32 %v2166_v38, 0.0  ;;  %1238 = vst.msk [vmem:[#allocation2 + $0x168] sm:$0xff] %vm1192_vm3, %v1183_v62  ;;  %1239 = vst.msk [vmem:[#allocation2 + $0x170] sm:$0xff] %vm1192_vm3, %v832_v5  ;;  %v1495_v19 = vmul.f32 %v3763_v18, %v3494_v58  ;;  %v1496_v10 = vmul.f32 %v3781_v33, %v3494_v58  ;;  %v3881_v63 = vld [vmem:[#allocation2 + $0xa8] sm:$0xff] }
 0x14d   : > { %v810_v35 = vmin.f32 %v756_v50, 6.0  ;;  %v757_v13 = vmax.f32 %v617_v29, 0.0  ;;  %v1596_v23 = vmul.f32 %v3804_v46, %v3504_v6  ;;  %v1597_v52 = vmul.f32 %v3812_v47, %v3504_v6 }
 0x14e   : > { %v2167_v3 = vadd.f32 %v3627_v9, %v2128_v17  ;;  %v2230_v51 = vmin.f32 %v2198_v24, 6.0  ;;  %v1527_v1 = vadd.f32 %v1495_v19, %v1427_v56  ;;  %v1528_v41 = vadd.f32 %v1496_v10, %v1428_v27  ;;  %v3883_v25 = vld [vmem:[#allocation2 + $0xb0] sm:$0xff] }
 0x14f   : > { %v1162_v18 = vsel %vm916_vm5, %v810_v35, 0.0  ;;  %v811_v33 = vmin.f32 %v757_v13, 6.0  ;;  %v1696_v32 = vmul.f32 %v3814_v36, %v3524_v39  ;;  %v1697_v2 = vmul.f32 %v3842_v30, %v3524_v39  ;;  %v3891_v43 = vld [vmem:[#allocation2 + $0xa9] sm:$0xff] }
 0x150   : > { %1217 = vst.msk [vmem:[#allocation2 + $0xc0] sm:$0xff] %vm1192_vm3, %v1162_v18  ;;  %v621_v31 = vpop.f32.mrb[52].mxu0  ;;  %v2199_v37 = vmax.f32 %v2167_v3, 0.0  ;;  %v1628_v57 = vadd.f32 %v1596_v23, %v1527_v1  ;;  %v1629_v0 = vadd.f32 %v1597_v52, %v1528_v41  ;;  %v1796_v14 = vmul.f32 %v3819_v60, %v3527_v40  ;;  %v3896_v38 = vld [vmem:[#allocation2 + $0xaa] sm:$0xff] }
 0x151   : > { %1218 = vst.msk [vmem:[#allocation2 + $0xc8] sm:$0xff] %vm1192_vm3, %v811_v33  ;;  %v622_v5 = vadd.f32 %v3865_v55, %v621_v31  ;;  %v3081_v56 = vpop.f32.mrb[53].mxu0  ;;  %v1797_v50 = vmul.f32 %v3844_v42, %v3527_v40  ;;  %v1897_v29 = vmul.f32 %v3533_v48, %v3881_v63  ;;  %v1898_v34 = vmul.f32 %v3533_v48, %v3883_v25  ;;  %v3906_v62 = vld [vmem:[#allocation2 + $0xb1] sm:$0xff] }
 0x152   : > { %v3908_v27 = vld [vmem:[#allocation2 + $0xb2] sm:$0xff]  ;;  %v624_v17 = vpop.f32.mrb[54].mxu0  ;;  %v2231_v24 = vmin.f32 %v2199_v37, 6.0  ;;  %v1728_v19 = vadd.f32 %v1696_v32, %v1628_v57  ;;  %v1729_v10 = vadd.f32 %v1697_v2, %v1629_v0  ;;  %v1997_v35 = vmul.f32 %v3536_v49, %v3891_v43 }
 0x153   : > { %v758_v13 = vmax.f32 %v622_v5, 0.0  ;;  %v625_v23 = vadd.f32 %v3865_v55, %v624_v17  ;;  %v3082_v52 = vpop.f32.mrb[55].mxu0  ;;  %v1998_v3 = vmul.f32 %v3536_v49, %v3906_v62  ;;  %v2097_v1 = vmul.f32 %v3555_v8, %v3896_v38 }
 0x154   : > { %v2258_v41 = vpack.c.bf16 %v2231_v24, %v2230_v51  ;;  %v1828_v18 = vadd.f32 %v1796_v14, %v1728_v19  ;;  %v1829_v33 = vadd.f32 %v1797_v50, %v1729_v10  ;;  %v2098_v32 = vmul.f32 %v3555_v8, %v3908_v27 }
 0x155   : > { %v812_v2 = vmin.f32 %v758_v13, 6.0  ;;  %v759_v31 = vmax.f32 %v625_v23, 0.0  ;;  %v705_v37 = vadd.f32 %v3865_v55, %v3648_v53  ;;  %v710_v57 = vadd.f32 %v3865_v55, %v3667_v26 }
 0x156   : > { %3147 = vmatprep.mubr.msk.bf16.mxu1 %vm1192_vm3, %v2258_v41  ;;  %v1929_v0 = vadd.f32 %v1897_v29, %v1828_v18  ;;  %v1930_v5 = vadd.f32 %v1898_v34, %v1829_v33  ;;  %v1297_v51 = vmul.f32 %v3804_v46, %v3480_v44  ;;  %v1298_v14 = vmul.f32 %v3812_v47, %v3480_v44 }
 0x157   : > { %v1164_v8 = vsel %vm975_vm6, %v812_v2, 0.0  ;;  %v813_v56 = vmin.f32 %v759_v31, 6.0  ;;  %v779_v50 = vmax.f32 %v705_v37, 0.0  ;;  %v780_v17 = vmax.f32 %v710_v57, 0.0 }
 0x158   : > { %1219 = vst.msk [vmem:[#allocation2 + $0xd0] sm:$0xff] %vm1192_vm3, %v1164_v8  ;;  %v629_v53 = vpop.f32.mrb[56].mxu0  ;;  %v2029_v26 = vadd.f32 %v1997_v35, %v1929_v0  ;;  %v2030_v24 = vadd.f32 %v1998_v3, %v1930_v5  ;;  %v1397_v29 = vmul.f32 %v3814_v36, %v3483_v45  ;;  %v1398_v46 = vmul.f32 %v3842_v30, %v3483_v45 }
 0x159   : > { %v1165_v47 = vsel %vm916_vm5, %v813_v56, 0.0  ;;  %v630_v34 = vadd.f32 %v3865_v55, %v629_v53  ;;  %v3085_v19 = vpop.f32.mrb[57].mxu0  ;;  %v833_v10 = vmin.f32 %v779_v50, 6.0  ;;  %v834_v13 = vmin.f32 %v780_v17, 6.0  ;;  %v3956_v17 = vld [vmem:[#allocation2 + $0xc0] sm:$0xff] }
 0x15a   : > { %1220 = vst.msk [vmem:[#allocation2 + $0xd8] sm:$0xff] %vm1192_vm3, %v1165_v47  ;;  %v632_v23 = vpop.f32.mrb[58].mxu0  ;;  %v2129_v52 = vadd.f32 %v2097_v1, %v2029_v26  ;;  %v2130_v35 = vadd.f32 %v2098_v32, %v2030_v24  ;;  %v1429_v3 = vadd.f32 %v1397_v29, %v1297_v51  ;;  %v1430_v41 = vadd.f32 %v1398_v46, %v1298_v14  ;;  %v3965_v24 = vld [vmem:[#allocation2 + $0xc8] sm:$0xff] }
 0x15b   : > { %v760_v18 = vmax.f32 %v630_v34, 0.0  ;;  %v633_v36 = vadd.f32 %v3865_v55, %v632_v23  ;;  %v3086_v33 = vpop.f32.mrb[59].mxu0  ;;  %v1185_v30 = vsel %vm975_vm6, %v833_v10, 0.0  ;;  %v1186_v2 = vsel %vm916_vm5, %v834_v13, 0.0  ;;  %v3967_v10 = vld [vmem:[#allocation2 + $0xc1] sm:$0xff] }
 0x15c   : > { %v2168_v31 = vadd.f32 %v3627_v9, %v2129_v52  ;;  %v2169_v37 = vadd.f32 %v3627_v9, %v2130_v35  ;;  %1240 = vst.msk [vmem:[#allocation2 + $0x178] sm:$0xff] %vm1192_vm3, %v1185_v30  ;;  %1241 = vst.msk [vmem:[#allocation2 + $0x180] sm:$0xff] %vm1192_vm3, %v1186_v2  ;;  %v1497_v1 = vmul.f32 %v3819_v60, %v3494_v58 }
 0x15d   : > { %v1498_v32 = vmul.f32 %v3844_v42, %v3494_v58  ;;  %v814_v57 = vmin.f32 %v760_v18, 6.0  ;;  %v761_v0 = vmax.f32 %v633_v36, 0.0  ;;  %v1598_v5 = vmul.f32 %v3881_v63, %v3504_v6  ;;  %v3978_v18 = vld [vmem:[#allocation2 + $0xc2] sm:$0xff] }
 0x15e   : > { %v1599_v51 = vmul.f32 %v3883_v25, %v3504_v6  ;;  %v2200_v14 = vmax.f32 %v2168_v31, 0.0  ;;  %v2201_v8 = vmax.f32 %v2169_v37, 0.0  ;;  %v1529_v56 = vadd.f32 %v1497_v1, %v1429_v3 }
 0x15f   : > { %v1530_v50 = vadd.f32 %v1498_v32, %v1430_v41  ;;  %1221 = vst.msk [vmem:[#allocation2 + $0xe0] sm:$0xff] %vm1192_vm3, %v814_v57  ;;  %v815_v60 = vmin.f32 %v761_v0, 6.0  ;;  %v1698_v42 = vmul.f32 %v3891_v43, %v3524_v39  ;;  %v1699_v53 = vmul.f32 %v3906_v62, %v3524_v39  ;;  %v3969_v13 = vld [vmem:[#allocation2 + $0xc9] sm:$0xff] }
 0x160   : > { %v1798_v26 = vmul.f32 %v3896_v38, %v3527_v40  ;;  %v637_v29 = vpop.f32.mrb[60].mxu0  ;;  %v2232_v46 = vmin.f32 %v2200_v14, 6.0  ;;  %v2233_v47 = vmin.f32 %v2201_v8, 6.0  ;;  %v1630_v34 = vadd.f32 %v1598_v5, %v1529_v56  ;;  %v3980_v36 = vld [vmem:[#allocation2 + $0xca] sm:$0xff]  ;;  %v3994_v8 = vld [vmem:[%s4590_s3 + $0x8] ss:$0 sm:$0xff] }
 0x161   : > { %v1631_v19 = vadd.f32 %v1599_v51, %v1530_v50  ;;  %v1167_v23 = vsel %vm975_vm6, %v815_v60, 0.0  ;;  %v638_v52 = vadd.f32 %v3865_v55, %v637_v29  ;;  %v3089_v35 = vpop.f32.mrb[61].mxu0  ;;  %v1799_v3 = vmul.f32 %v3908_v27, %v3527_v40 }
 0x162   : > { %v1899_v41 = vmul.f32 %v3533_v48, %v3956_v17  ;;  %1222 = vst.msk [vmem:[#allocation2 + $0xe8] sm:$0xff] %vm1192_vm3, %v1167_v23  ;;  %v2259_v33 = vpack.c.bf16 %v2233_v47, %v2232_v46  ;;  %v640_v30 = vpop.f32.mrb[62].mxu0  ;;  %v1730_v2 = vadd.f32 %v1698_v42, %v1630_v34  ;;  %v1900_v37 = vmul.f32 %v3533_v48, %v3965_v24 }
 0x163   : > { %v1731_v31 = vadd.f32 %v1699_v53, %v1631_v19  ;;  %v762_v1 = vmax.f32 %v638_v52, 0.0  ;;  %v641_v32 = vadd.f32 %v3865_v55, %v640_v30  ;;  %v3090_v57 = vpop.f32.mrb[63].mxu0  ;;  %v1999_v0 = vmul.f32 %v3536_v49, %v3967_v10 }
 0x164   : > { %v2000_v5 = vmul.f32 %v3536_v49, %v3969_v13  ;;  %3148 = vmatmul.mubr.msk.bf16.gmra.mrb[44].mxu1 %vm1192_vm3, %v2259_v33  ;;  %v1830_v51 = vadd.f32 %v1798_v26, %v1730_v2  ;;  %v2099_v56 = vmul.f32 %v3994_v8, %v3978_v18  ;;  %v2100_v50 = vmul.f32 %v3994_v8, %v3980_v36 }
 0x165   : > { %v1831_v14 = vadd.f32 %v1799_v3, %v1731_v31  ;;  %v816_v60 = vmin.f32 %v762_v1, 6.0  ;;  %v763_v42 = vmax.f32 %v641_v32, 0.0  ;;  %v713_v53 = vadd.f32 %v3865_v55, %v3678_v61 }
 0x166   : > { %v718_v26 = vadd.f32 %v3865_v55, %v3697_v59  ;;  %v1931_v29 = vadd.f32 %v1899_v41, %v1830_v51  ;;  %v1299_v47 = vmul.f32 %v3881_v63, %v3480_v44  ;;  %v1300_v34 = vmul.f32 %v3883_v25, %v3480_v44 }
 0x167   : > { %v1932_v46 = vadd.f32 %v1900_v37, %v1831_v14  ;;  %v1168_v19 = vsel %vm916_vm5, %v816_v60, 0.0  ;;  %v817_v23 = vmin.f32 %v763_v42, 6.0  ;;  %v781_v52 = vmax.f32 %v713_v53, 0.0 }
 0x168   : > { %v782_v35 = vmax.f32 %v718_v26, 0.0  ;;  %1223 = vst.msk [vmem:[#allocation2 + $0xf0] sm:$0xff] %vm1192_vm3, %v1168_v19  ;;  %v645_v61 = vpop.f32.mrb[64].mxu0  ;;  %v2031_v3 = vadd.f32 %v1999_v0, %v1931_v29  ;;  %v1399_v59 = vmul.f32 %v3891_v43, %v3483_v45  ;;  %v1400_v63 = vmul.f32 %v3906_v62, %v3483_v45 }
 0x169   : > { %v2032_v33 = vadd.f32 %v2000_v5, %v1932_v46  ;;  %1224 = vst.msk [vmem:[#allocation2 + $0xf8] sm:$0xff] %vm1192_vm3, %v817_v23  ;;  %v646_v25 = vadd.f32 %v3865_v55, %v645_v61  ;;  %v3093_v41 = vpop.f32.mrb[65].mxu0  ;;  %v835_v30 = vmin.f32 %v781_v52, 6.0  ;;  %v1499_v31 = vmul.f32 %v3896_v38, %v3494_v58  ;;  %v4040_v61 = vld [vmem:[#allocation2 + $0xe0] sm:$0xff] }
 0x16a   : > { %v836_v2 = vmin.f32 %v782_v35, 6.0  ;;  %v648_v37 = vpop.f32.mrb[66].mxu0  ;;  %v2131_v1 = vadd.f32 %v2099_v56, %v2031_v3  ;;  %v1431_v57 = vadd.f32 %v1399_v59, %v1299_v47  ;;  %v1432_v0 = vadd.f32 %v1400_v63, %v1300_v34  ;;  %v4038_v35 = vld [vmem:[#allocation2 + $0xd8] sm:$0xff] }
 0x16b   : > { %v2132_v32 = vadd.f32 %v2100_v50, %v2032_v33  ;;  %v764_v5 = vmax.f32 %v646_v25, 0.0  ;;  %v649_v43 = vadd.f32 %v3865_v55, %v648_v37  ;;  %v3094_v51 = vpop.f32.mrb[67].mxu0  ;;  %1242 = vst.msk [vmem:[#allocation2 + $0x188] sm:$0xff] %vm1192_vm3, %v835_v30  ;;  %v1500_v14 = vmul.f32 %v3908_v27, %v3494_v58  ;;  %v4045_v41 = vld [vmem:[#allocation2 + $0xd9] sm:$0xff] }
 0x16c   : > { %v1188_v62 = vsel %vm975_vm6, %v836_v2, 0.0  ;;  %v2170_v60 = vadd.f32 %v3627_v9, %v2131_v1  ;;  %v1531_v56 = vadd.f32 %v1499_v31, %v1431_v57  ;;  %v1600_v50 = vmul.f32 %v3956_v17, %v3504_v6  ;;  %v4054_v57 = vld [vmem:[#allocation2 + $0xda] sm:$0xff] }
 0x16d   : > { %v2171_v38 = vadd.f32 %v3627_v9, %v2132_v32  ;;  %1243 = vst.msk [vmem:[#allocation2 + $0x190] sm:$0xff] %vm1192_vm3, %v1188_v62  ;;  %v818_v42 = vmin.f32 %v764_v5, 6.0  ;;  %v765_v53 = vmax.f32 %v649_v43, 0.0  ;;  %v1532_v26 = vadd.f32 %v1500_v14, %v1432_v0  ;;  %v4052_v32 = vld [vmem:[#allocation2 + $0xe1] sm:$0xff] }
 0x16e   : > { %v1601_v29 = vmul.f32 %v3965_v24, %v3504_v6  ;;  %v2202_v46 = vmax.f32 %v2170_v60, 0.0  ;;  %v1632_v34 = vadd.f32 %v1600_v50, %v1531_v56  ;;  %v1700_v27 = vmul.f32 %v3967_v10, %v3524_v39  ;;  %v4056_v0 = vld [vmem:[#allocation2 + $0xe2] sm:$0xff] }
 0x16f   : > { %v2203_v47 = vmax.f32 %v2171_v38, 0.0  ;;  %v1170_v9 = vsel %vm975_vm6, %v818_v42, 0.0  ;;  %v819_v19 = vmin.f32 %v765_v53, 6.0  ;;  %v1701_v52 = vmul.f32 %v3969_v13, %v3524_v39 }
 0x170   : > { %v1633_v23 = vadd.f32 %v1601_v29, %v1532_v26  ;;  %1225 = vst.msk [vmem:[#allocation2 + $0x100] sm:$0xff] %vm1192_vm3, %v1170_v9  ;;  %v2234_v3 = vmin.f32 %v2202_v46, 6.0  ;;  %v653_v59 = vpop.f32.mrb[68].mxu0  ;;  %v1732_v63 = vadd.f32 %v1700_v27, %v1632_v34  ;;  %v1800_v25 = vmul.f32 %v3978_v18, %v3527_v40 }
 0x171   : > { %v2235_v33 = vmin.f32 %v2203_v47, 6.0  ;;  %v1171_v30 = vsel %vm916_vm5, %v819_v19, 0.0  ;;  %v654_v2 = vadd.f32 %v3865_v55, %v653_v59  ;;  %v3097_v31 = vpop.f32.mrb[69].mxu0  ;;  %v1801_v1 = vmul.f32 %v3980_v36, %v3527_v40 }
 0x172   : > { %v1733_v37 = vadd.f32 %v1701_v52, %v1633_v23  ;;  %1226 = vst.msk [vmem:[#allocation2 + $0x108] sm:$0xff] %vm1192_vm3, %v1171_v30  ;;  %v656_v43 = vpop.f32.mrb[70].mxu0  ;;  %v1832_v51 = vadd.f32 %v1800_v25, %v1732_v63  ;;  %v1901_v28 = vmul.f32 %v3533_v48, %v4038_v35  ;;  %v1902_v62 = vmul.f32 %v3533_v48, %v4040_v61  ;;  %v725_v30 = vpop.f32.mrb[32].mxu1 }
 0x173   : > { %v2260_v5 = vpack.c.bf16 %v2235_v33, %v2234_v3  ;;  %v766_v14 = vmax.f32 %v654_v2, 0.0  ;;  %v657_v60 = vadd.f32 %v3865_v55, %v656_v43  ;;  %v3098_v38 = vpop.f32.mrb[71].mxu0  ;;  %v2001_v50 = vmul.f32 %v3536_v49, %v4045_v41 }
 0x174   : > { %v1833_v56 = vadd.f32 %v1801_v1, %v1733_v37  ;;  %v1933_v42 = vadd.f32 %v1901_v28, %v1832_v51  ;;  %v2002_v53 = vmul.f32 %v3536_v49, %v4052_v32  ;;  %v2101_v26 = vmul.f32 %v3994_v8, %v4054_v57  ;;  %v3133_v37 = vpop.f32.mrb[33].mxu1  ;;  %v4102_v1 = vld [vmem:[%s4591_s4] ss:$0 sm:$0xff]  ;;  %v4107_v28 = vld [vmem:[#allocation2 + $0xf1] sm:$0xff] }
 0x175   : > { %3151 = vmatprep.mubr.msk.bf16.mxu1 %vm1192_vm3, %v2260_v5  ;;  %v2102_v29 = vmul.f32 %v3994_v8, %v4056_v0  ;;  %v820_v46 = vmin.f32 %v766_v14, 6.0  ;;  %v767_v47 = vmax.f32 %v657_v60, 0.0  ;;  %v1301_v34 = vmul.f32 %v3956_v17, %v3480_v44  ;;  %v4111_v14 = vld [vmem:[#allocation2 + $0xf2] sm:$0xff]  ;;  %v728_v60 = vpop.f32.mrb[34].mxu1 }
 0x176   : > { %v1934_v55 = vadd.f32 %v1902_v62, %v1833_v56  ;;  %v2033_v27 = vadd.f32 %v2001_v50, %v1933_v42  ;;  %v1302_v9 = vmul.f32 %v3965_v24, %v3480_v44  ;;  %v1401_v19 = vmul.f32 %v3967_v10, %v3483_v45  ;;  %v4088_v10 = vld [vmem:[#allocation2 + $0xf0] sm:$0xff] }
 0x177   : > { %v1402_v23 = vmul.f32 %v3969_v13, %v3483_v45  ;;  %1227 = vst.msk [vmem:[#allocation2 + $0x110] sm:$0xff] %vm1192_vm3, %v820_v46  ;;  %v821_v52 = vmin.f32 %v767_v47, 6.0  ;;  %v1501_v33 = vmul.f32 %v3978_v18, %v3494_v58  ;;  %v1502_v17 = vmul.f32 %v3980_v36, %v3494_v58  ;;  %v4096_v36 = vld [vmem:[#allocation2 + $0xf8] sm:$0xff] }
 0x178   : > { %v2034_v3 = vadd.f32 %v2002_v53, %v1934_v55  ;;  %v2133_v59 = vadd.f32 %v2101_v26, %v2033_v27  ;;  %v1433_v63 = vadd.f32 %v1401_v19, %v1301_v34  ;;  %v1602_v24 = vmul.f32 %v4038_v35, %v3504_v6  ;;  %v4109_v62 = vld [vmem:[#allocation2 + $0xf9] sm:$0xff]  ;;  %v3134_v26 = vpop.f32.mrb[35].mxu1 }
 0x179   : > { %v1434_v25 = vadd.f32 %v1402_v23, %v1302_v9  ;;  %v1173_v13 = vsel %vm975_vm6, %v821_v52, 0.0  ;;  %v1603_v31 = vmul.f32 %v4040_v61, %v3504_v6  ;;  %v1702_v18 = vmul.f32 %v4045_v41, %v3524_v39  ;;  %v4120_v53 = vld [vmem:[#allocation2 + $0xfa] sm:$0xff] }
 0x17a   : > { %v2134_v2 = vadd.f32 %v2102_v29, %v2034_v3  ;;  %1228 = vst.msk [vmem:[#allocation2 + $0x118] sm:$0xff] %vm1192_vm3, %v1173_v13  ;;  %v2172_v54 = vadd.f32 %v4102_v1, %v2133_v59  ;;  %v1533_v5 = vadd.f32 %v1501_v33, %v1433_v63  ;;  %v1703_v51 = vmul.f32 %v4052_v32, %v3524_v39 }
 0x17b   : > { %v1534_v43 = vadd.f32 %v1502_v17, %v1434_v25  ;;  %v1802_v56 = vmul.f32 %v4054_v57, %v3527_v40  ;;  %v1803_v50 = vmul.f32 %v4056_v0, %v3527_v40  ;;  %v1903_v42 = vmul.f32 %v3533_v48, %v4088_v10 }
 0x17c   : > { %v2173_v38 = vadd.f32 %v4102_v1, %v2134_v2  ;;  %v2204_v29 = vmax.f32 %v2172_v54, 0.0  ;;  %v1634_v46 = vadd.f32 %v1602_v24, %v1533_v5  ;;  %v1904_v55 = vmul.f32 %v3533_v48, %v4096_v36 }
 0x17d   : > { %v1635_v47 = vadd.f32 %v1603_v31, %v1534_v43  ;;  %v2003_v27 = vmul.f32 %v3536_v49, %v4107_v28  ;;  %v2004_v9 = vmul.f32 %v3536_v49, %v4109_v62  ;;  %v2103_v19 = vmul.f32 %v3994_v8, %v4111_v14  ;;  %v1869_v43 = vld [vmem:[#allocation2 + $0x108] sm:$0xff] }
 0x17e   : > { %v2205_v34 = vmax.f32 %v2173_v38, 0.0  ;;  %v2236_v23 = vmin.f32 %v2204_v29, 6.0  ;;  %v1734_v52 = vadd.f32 %v1702_v18, %v1634_v46  ;;  %v2104_v33 = vmul.f32 %v3994_v8, %v4120_v53  ;;  %v2069_v46 = vld [vmem:[#allocation2 + $0x10a] sm:$0xff] }
 0x17f   : > { %v1735_v3 = vadd.f32 %v1703_v51, %v1635_v47  ;;  %v1303_v59 = vmul.f32 %v4038_v35, %v3480_v44  ;;  %v1304_v63 = vmul.f32 %v4040_v61, %v3480_v44  ;;  %v1403_v25 = vmul.f32 %v4045_v41, %v3483_v45  ;;  %v1870_v51 = vld [vmem:[#allocation2 + $0x110] sm:$0xff] }
 0x180   : > { %v2237_v17 = vmin.f32 %v2205_v34, 6.0  ;;  %v1834_v24 = vadd.f32 %v1802_v56, %v1734_v52  ;;  %v1404_v13 = vmul.f32 %v4052_v32, %v3483_v45  ;;  %v1503_v2 = vmul.f32 %v4054_v57, %v3494_v58  ;;  %v1969_v32 = vld [vmem:[#allocation2 + $0x109] sm:$0xff] }
 0x181   : > { %v1835_v30 = vadd.f32 %v1803_v50, %v1735_v3  ;;  %v1435_v18 = vadd.f32 %v1403_v25, %v1303_v59  ;;  %v1504_v37 = vmul.f32 %v4056_v0, %v3494_v58  ;;  %v1604_v35 = vmul.f32 %v4088_v10, %v3504_v6  ;;  %v1970_v56 = vld [vmem:[#allocation2 + $0x111] sm:$0xff] }
 0x182   : > { %v2261_v31 = vpack.c.bf16 %v2237_v17, %v2236_v23  ;;  %v1935_v61 = vadd.f32 %v1903_v42, %v1834_v24  ;;  %v1436_v5 = vadd.f32 %v1404_v13, %v1304_v63  ;;  %v1605_v41 = vmul.f32 %v4096_v36, %v3504_v6  ;;  %v2070_v47 = vld [vmem:[#allocation2 + $0x112] sm:$0xff] }
 0x183   : > { %v1936_v54 = vadd.f32 %v1904_v55, %v1835_v30  ;;  %v1535_v57 = vadd.f32 %v1503_v2, %v1435_v18  ;;  %v1704_v60 = vmul.f32 %v4107_v28, %v3524_v39  ;;  %v1705_v0 = vmul.f32 %v4109_v62, %v3524_v39 }
 0x184   : > { %3152 = vmatmul.mubr.msk.bf16.gmra.mrb[48].mxu1 %vm1192_vm3, %v2261_v31  ;;  %v1804_v38 = vmul.f32 %v4111_v14, %v3527_v40  ;;  %v2035_v50 = vadd.f32 %v2003_v27, %v1935_v61  ;;  %v1536_v26 = vadd.f32 %v1504_v37, %v1436_v5  ;;  %v1805_v29 = vmul.f32 %v4120_v53, %v3527_v40 }
 0x185   : > { %v2036_v42 = vadd.f32 %v2004_v9, %v1936_v54  ;;  %v1636_v55 = vadd.f32 %v1604_v35, %v1535_v57  ;;  %v1905_v34 = vmul.f32 %v3533_v48, %v1869_v43  ;;  %v1906_v23 = vmul.f32 %v3533_v48, %v1870_v51 }
 0x186   : > { %v2005_v52 = vmul.f32 %v3536_v49, %v1969_v32  ;;  %v2135_v3 = vadd.f32 %v2103_v19, %v2035_v50  ;;  %v1637_v59 = vadd.f32 %v1605_v41, %v1536_v26  ;;  %v2006_v63 = vmul.f32 %v3536_v49, %v1970_v56 }
 0x187   : > { %v2136_v17 = vadd.f32 %v2104_v33, %v2036_v42  ;;  %v1736_v27 = vadd.f32 %v1704_v60, %v1636_v55  ;;  %v2105_v9 = vmul.f32 %v3994_v8, %v2069_v46  ;;  %v2106_v25 = vmul.f32 %v3994_v8, %v2070_v47 }
 0x188   : > { %v1305_v24 = vmul.f32 %v4088_v10, %v3480_v44  ;;  %v2174_v30 = vadd.f32 %v4102_v1, %v2135_v3  ;;  %v1737_v2 = vadd.f32 %v1705_v0, %v1637_v59  ;;  %v1306_v19 = vmul.f32 %v4096_v36, %v3480_v44 }
 0x189   : > { %v2175_v13 = vadd.f32 %v4102_v1, %v2136_v17  ;;  %v1836_v33 = vadd.f32 %v1804_v38, %v1736_v27  ;;  %v1405_v31 = vmul.f32 %v4107_v28, %v3483_v45  ;;  %v1406_v18 = vmul.f32 %v4109_v62, %v3483_v45 }
 0x18a   : > { %v1505_v37 = vmul.f32 %v4111_v14, %v3494_v58  ;;  %v2206_v35 = vmax.f32 %v2174_v30, 0.0  ;;  %v1837_v61 = vadd.f32 %v1805_v29, %v1737_v2  ;;  %v1506_v54 = vmul.f32 %v4120_v53, %v3494_v58 }
 0x18b   : > { %v2207_v10 = vmax.f32 %v2175_v13, 0.0  ;;  %v1937_v5 = vadd.f32 %v1905_v34, %v1836_v33  ;;  %v1437_v41 = vadd.f32 %v1405_v31, %v1305_v24  ;;  %v1438_v57 = vadd.f32 %v1406_v18, %v1306_v19 }
 0x18c   : > { %v1606_v36 = vmul.f32 %v1869_v43, %v3504_v6  ;;  %v2238_v60 = vmin.f32 %v2206_v35, 6.0  ;;  %v1938_v28 = vadd.f32 %v1906_v23, %v1837_v61  ;;  %v1607_v38 = vmul.f32 %v1870_v51, %v3504_v6  ;;  %v3207_v61 = vld [vmem:[#allocation2 + $0x122] sm:$0xff] }
 0x18d   : > { %v2239_v0 = vmin.f32 %v2207_v10, 6.0  ;;  %v2037_v62 = vadd.f32 %v2005_v52, %v1937_v5  ;;  %v1537_v50 = vadd.f32 %v1505_v37, %v1437_v41  ;;  %v1538_v42 = vadd.f32 %v1506_v54, %v1438_v57  ;;  %v4196_v57 = vld [vmem:[#allocation2 + $0x138] sm:$0xff] }
 0x18e   : > { %v1706_v14 = vmul.f32 %v1969_v32, %v3524_v39  ;;  %v2038_v29 = vadd.f32 %v2006_v63, %v1938_v28  ;;  %v1707_v55 = vmul.f32 %v1970_v56, %v3524_v39  ;;  %v1806_v53 = vmul.f32 %v2069_v46, %v3527_v40  ;;  %v4200_v28 = vld [vmem:[#allocation2 + $0x140] sm:$0xff] }
 0x18f   : > { %v2262_v26 = vpack.c.bf16 %v2239_v0, %v2238_v60  ;;  %v2137_v34 = vadd.f32 %v2105_v9, %v2037_v62  ;;  %v1638_v3 = vadd.f32 %v1606_v36, %v1537_v50  ;;  %v1639_v17 = vadd.f32 %v1607_v38, %v1538_v42  ;;  %v3208_v60 = vld [vmem:[#allocation2 + $0x12a] sm:$0xff]  ;;  %v4209_v42 = vld [vmem:[#allocation2 + $0x139] sm:$0xff] }
 0x190   : > { %v1807_v59 = vmul.f32 %v2070_v47, %v3527_v40  ;;  %v2138_v23 = vadd.f32 %v2106_v25, %v2038_v29  ;;  %v1307_v52 = vmul.f32 %v1869_v43, %v3480_v44  ;;  %v1308_v27 = vmul.f32 %v1870_v51, %v3480_v44 }
 0x191   : > { %3155 = vmatprep.mubr.msk.bf16.mxu1 %vm1192_vm3, %v2262_v26  ;;  %v1407_v24 = vmul.f32 %v1969_v32, %v3483_v45  ;;  %v2176_v63 = vadd.f32 %v4102_v1, %v2137_v34  ;;  %v1738_v30 = vadd.f32 %v1706_v14, %v1638_v3  ;;  %v1739_v13 = vadd.f32 %v1707_v55, %v1639_v17  ;;  %v3206_v32 = vld [vmem:[#allocation2 + $0x129] sm:$0xff]  ;;  %v4218_v55 = vld [vmem:[#allocation2 + $0x13a] sm:$0xff] }
 0x192   : > { %v1408_v2 = vmul.f32 %v1970_v56, %v3483_v45  ;;  %v2177_v9 = vadd.f32 %v4102_v1, %v2138_v23  ;;  %v1507_v33 = vmul.f32 %v2069_v46, %v3494_v58  ;;  %v1508_v31 = vmul.f32 %v2070_v47, %v3494_v58  ;;  %v4222_v34 = vld [vmem:[#allocation2 + $0x142] sm:$0xff] }
 0x193   : > { %v1439_v19 = vadd.f32 %v1407_v24, %v1307_v52  ;;  %v2208_v25 = vmax.f32 %v2176_v63, 0.0  ;;  %v1838_v18 = vadd.f32 %v1806_v53, %v1738_v30  ;;  %v1839_v43 = vadd.f32 %v1807_v59, %v1739_v13  ;;  %v3209_v59 = vld [vmem:[#allocation2 + $0x120] sm:$0xff]  ;;  %v3210_v52 = vld [vmem:[#allocation2 + $0x128] sm:$0xff] }
 0x194   : > { %v1440_v37 = vadd.f32 %v1408_v2, %v1308_v27  ;;  %v2209_v51 = vmax.f32 %v2177_v9, 0.0  ;;  %v1709_v10 = vmul.f32 %v3206_v32, %v3524_v39  ;;  %v1808_v54 = vmul.f32 %v3207_v61, %v3527_v40  ;;  %v3211_v63 = vld [vmem:[#allocation2 + $0x121] sm:$0xff] }
 0x195   : > { %v1539_v35 = vadd.f32 %v1507_v33, %v1439_v19  ;;  %v2240_v56 = vmin.f32 %v2208_v25, 6.0  ;;  %v1939_v5 = vadd.f32 %v3547_v4, %v1838_v18  ;;  %v1940_v41 = vadd.f32 %v3558_v11, %v1839_v43 }
 0x196   : > { %v1540_v46 = vadd.f32 %v1508_v31, %v1440_v37  ;;  %v2241_v47 = vmin.f32 %v2209_v51, 6.0  ;;  %v1809_v0 = vmul.f32 %v3208_v60, %v3527_v40  ;;  %v1909_v38 = vmul.f32 %v3533_v48, %v4196_v57 }
 0x197   : > { %v1640_v36 = vadd.f32 %v3550_v7, %v1539_v35  ;;  %v2039_v62 = vadd.f32 %v3561_v12, %v1939_v5  ;;  %v2040_v4 = vadd.f32 %v3596_v20, %v1940_v41  ;;  %v1910_v50 = vmul.f32 %v3533_v48, %v4200_v28  ;;  %v4211_v7 = vld [vmem:[#allocation2 + $0x141] sm:$0xff]  ;;  %v4241_v5 = vld [vmem:[#allocation2 + $0x150] sm:$0xff] }
 0x198   : > { %v1641_v11 = vadd.f32 %v3567_v16, %v1540_v46  ;;  %v2263_v14 = vpack.c.bf16 %v2241_v47, %v2240_v56  ;;  %v2009_v29 = vmul.f32 %v3536_v49, %v4209_v42  ;;  %v2010_v12 = vmul.f32 %v3536_v49, %v4211_v7 }
 0x199   : > { %v1740_v26 = vadd.f32 %v3572_v22, %v1640_v36  ;;  %v2139_v16 = vadd.f32 %v3564_v15, %v2039_v62  ;;  %v2140_v20 = vadd.f32 %v3599_v21, %v2040_v4  ;;  %v2109_v3 = vmul.f32 %v3994_v8, %v4218_v55  ;;  %v4247_v36 = vld [vmem:[#allocation2 + $0x158] sm:$0xff] }
 0x19a   : > { %v1741_v53 = vadd.f32 %v1709_v10, %v1641_v11  ;;  %3156 = vmatmul.mubr.msk.bf16.gmra.mrb[52].mxu1 %vm1192_vm3, %v2263_v14  ;;  %v2110_v17 = vmul.f32 %v3994_v8, %v4222_v34  ;;  %v1309_v23 = vmul.f32 %v3209_v59, %v3480_v44  ;;  %v1310_v15 = vmul.f32 %v3210_v52, %v3480_v44  ;;  %v4253_v11 = vld [vmem:[#allocation2 + $0x159] sm:$0xff] }
 0x19b   : > { %v1840_v22 = vadd.f32 %v1808_v54, %v1740_v26  ;;  %v2178_v21 = vadd.f32 %v4102_v1, %v2139_v16  ;;  %v2179_v27 = vadd.f32 %v4102_v1, %v2140_v20  ;;  %v1409_v30 = vmul.f32 %v3211_v63, %v3483_v45  ;;  %v4262_v16 = vld [vmem:[#allocation2 + $0x15a] sm:$0xff] }
 0x19c   : > { %v1841_v24 = vadd.f32 %v1809_v0, %v1741_v53  ;;  %v1410_v2 = vmul.f32 %v3206_v32, %v3483_v45  ;;  %v1509_v9 = vmul.f32 %v3207_v61, %v3494_v58  ;;  %v1510_v19 = vmul.f32 %v3208_v60, %v3494_v58  ;;  %v4249_v60 = vld [vmem:[#allocation2 + $0x151] sm:$0xff] }
 0x19d   : > { %v1941_v13 = vadd.f32 %v1909_v38, %v1840_v22  ;;  %v2210_v33 = vmax.f32 %v2178_v21, 0.0  ;;  %v2211_v31 = vmax.f32 %v2179_v27, 0.0  ;;  %v1441_v18 = vadd.f32 %v1409_v30, %v1309_v23 }
 0x19e   : > { %v1942_v25 = vadd.f32 %v1910_v50, %v1841_v24  ;;  %v1442_v37 = vadd.f32 %v1410_v2, %v1310_v15  ;;  %v1610_v51 = vmul.f32 %v4196_v57, %v3504_v6  ;;  %v1611_v35 = vmul.f32 %v4200_v28, %v3504_v6  ;;  %v4255_v50 = vld [vmem:[#allocation2 + $0x152] sm:$0xff] }
 0x19f   : > { %v2041_v43 = vadd.f32 %v2009_v29, %v1941_v13  ;;  %v2242_v10 = vmin.f32 %v2210_v33, 6.0  ;;  %v2243_v54 = vmin.f32 %v2211_v31, 6.0  ;;  %v1541_v32 = vadd.f32 %v1509_v9, %v1441_v18 }
 0x1a0   : > { %v2042_v56 = vadd.f32 %v2010_v12, %v1942_v25  ;;  %v1542_v41 = vadd.f32 %v1510_v19, %v1442_v37  ;;  %v1710_v46 = vmul.f32 %v4209_v42, %v3524_v39  ;;  %v1711_v47 = vmul.f32 %v4211_v7, %v3524_v39 }
 0x1a1   : > { %v2141_v61 = vadd.f32 %v2109_v3, %v2041_v43  ;;  %v2264_v0 = vpack.c.bf16 %v2243_v54, %v2242_v10  ;;  %v1642_v62 = vadd.f32 %v1610_v51, %v1541_v32  ;;  %v1810_v4 = vmul.f32 %v4218_v55, %v3527_v40  ;;  %v4302_v32 = vld [vmem:[#allocation2 + $0x171] sm:$0xff] }
 0x1a2   : > { %v2142_v38 = vadd.f32 %v2110_v17, %v2042_v56  ;;  %v1643_v26 = vadd.f32 %v1611_v35, %v1542_v41  ;;  %v1811_v29 = vmul.f32 %v4222_v34, %v3527_v40  ;;  %v1911_v12 = vmul.f32 %v3533_v48, %v4241_v5  ;;  %v4292_v35 = vld [vmem:[#allocation2 + $0x168] sm:$0xff] }
 0x1a3   : > { %v2180_v14 = vadd.f32 %v4102_v1, %v2141_v61  ;;  %3159 = vmatprep.mubr.msk.bf16.mxu1 %vm1192_vm3, %v2264_v0  ;;  %v1742_v53 = vadd.f32 %v1710_v46, %v1642_v62  ;;  %v1912_v3 = vmul.f32 %v3533_v48, %v4247_v36  ;;  %v2011_v22 = vmul.f32 %v3536_v49, %v4249_v60  ;;  %v4300_v56 = vld [vmem:[#allocation2 + $0x169] sm:$0xff] }
 0x1a4   : > { %v2181_v20 = vadd.f32 %v4102_v1, %v2142_v38  ;;  %v1743_v59 = vadd.f32 %v1711_v47, %v1643_v26  ;;  %v2012_v23 = vmul.f32 %v3536_v49, %v4253_v11  ;;  %v2111_v52 = vmul.f32 %v3994_v8, %v4255_v50  ;;  %v4309_v0 = vld [vmem:[#allocation2 + $0x16a] sm:$0xff]  ;;  %v4311_v38 = vld [vmem:[#allocation2 + $0x172] sm:$0xff] }
 0x1a5   : > { %v2212_v17 = vmax.f32 %v2180_v14, 0.0  ;;  %v1842_v21 = vadd.f32 %v1810_v4, %v1742_v53  ;;  %v2112_v27 = vmul.f32 %v3994_v8, %v4262_v16  ;;  %v1311_v24 = vmul.f32 %v4196_v57, %v3480_v44 }
 0x1a6   : > { %v2213_v15 = vmax.f32 %v2181_v20, 0.0  ;;  %v1843_v30 = vadd.f32 %v1811_v29, %v1743_v59  ;;  %v1312_v13 = vmul.f32 %v4200_v28, %v3480_v44  ;;  %v1411_v2 = vmul.f32 %v4209_v42, %v3483_v45 }
 0x1a7   : > { %v2244_v63 = vmin.f32 %v2212_v17, 6.0  ;;  %v1943_v19 = vadd.f32 %v1911_v12, %v1842_v21  ;;  %v1412_v33 = vmul.f32 %v4211_v7, %v3483_v45  ;;  %v1511_v31 = vmul.f32 %v4218_v55, %v3494_v58  ;;  %v4294_v7 = vld [vmem:[#allocation2 + $0x170] sm:$0xff] }
 0x1a8   : > { %v2245_v9 = vmin.f32 %v2213_v15, 6.0  ;;  %v1944_v25 = vadd.f32 %v1912_v3, %v1843_v30  ;;  %v1443_v18 = vadd.f32 %v1411_v2, %v1311_v24  ;;  %v1512_v57 = vmul.f32 %v4222_v34, %v3494_v58 }
 0x1a9   : > { %v1612_v43 = vmul.f32 %v4241_v5, %v3504_v6  ;;  %v2043_v37 = vadd.f32 %v2011_v22, %v1943_v19  ;;  %v1444_v51 = vadd.f32 %v1412_v33, %v1312_v13  ;;  %v1613_v42 = vmul.f32 %v4247_v36, %v3504_v6 }
 0x1aa   : > { %v2265_v28 = vpack.c.bf16 %v2245_v9, %v2244_v63  ;;  %v2044_v10 = vadd.f32 %v2012_v23, %v1944_v25  ;;  %v1543_v55 = vadd.f32 %v1511_v31, %v1443_v18  ;;  %v1712_v54 = vmul.f32 %v4249_v60, %v3524_v39 }
 0x1ab   : > { %v1713_v34 = vmul.f32 %v4253_v11, %v3524_v39  ;;  %v2143_v61 = vadd.f32 %v2111_v52, %v2043_v37  ;;  %v1544_v41 = vadd.f32 %v1512_v57, %v1444_v51  ;;  %v1812_v46 = vmul.f32 %v4255_v50, %v3527_v40  ;;  %v1879_v57 = vld [vmem:[#allocation2 + $0x180] sm:$0xff] }
 0x1ac   : > { %3160 = vmatmul.mubr.msk.bf16.gmra.mrb[56].mxu1 %vm1192_vm3, %v2265_v28  ;;  %v1813_v47 = vmul.f32 %v4262_v16, %v3527_v40  ;;  %v2144_v62 = vadd.f32 %v2112_v27, %v2044_v10  ;;  %v1644_v4 = vadd.f32 %v1612_v43, %v1543_v55  ;;  %v1913_v14 = vmul.f32 %v3533_v48, %v4292_v35  ;;  %v1979_v51 = vld [vmem:[#allocation2 + $0x181] sm:$0xff] }
 0x1ad   : > { %v1914_v26 = vmul.f32 %v3533_v48, %v4294_v7  ;;  %v2182_v29 = vadd.f32 %v4102_v1, %v2143_v61  ;;  %v1645_v12 = vadd.f32 %v1613_v42, %v1544_v41  ;;  %v2013_v20 = vmul.f32 %v3536_v49, %v4300_v56  ;;  %v1980_v42 = vld [vmem:[#allocation2 + $0x189] sm:$0xff] }
 0x1ae   : > { %v2014_v53 = vmul.f32 %v3536_v49, %v4302_v32  ;;  %v2183_v3 = vadd.f32 %v4102_v1, %v2144_v62  ;;  %v1744_v22 = vadd.f32 %v1712_v54, %v1644_v4  ;;  %v2113_v17 = vmul.f32 %v3994_v8, %v4309_v0  ;;  %v2079_v61 = vld [vmem:[#allocation2 + $0x182] sm:$0xff]  ;;  %v2080_v4 = vld [vmem:[#allocation2 + $0x18a] sm:$0xff] }
 0x1af   : > { %v2114_v59 = vmul.f32 %v3994_v8, %v4311_v38  ;;  %v2214_v23 = vmax.f32 %v2182_v29, 0.0  ;;  %v1745_v52 = vadd.f32 %v1713_v34, %v1645_v12  ;;  %v1313_v15 = vmul.f32 %v4241_v5, %v3480_v44 }
 0x1b0   : > { %v1314_v21 = vmul.f32 %v4247_v36, %v3480_v44  ;;  %v2215_v27 = vmax.f32 %v2183_v3, 0.0  ;;  %v1844_v24 = vadd.f32 %v1812_v46, %v1744_v22  ;;  %v1413_v63 = vmul.f32 %v4249_v60, %v3483_v45 }
 0x1b1   : > { %v1414_v30 = vmul.f32 %v4253_v11, %v3483_v45  ;;  %v2246_v13 = vmin.f32 %v2214_v23, 6.0  ;;  %v1845_v2 = vadd.f32 %v1813_v47, %v1745_v52  ;;  %v1513_v9 = vmul.f32 %v4255_v50, %v3494_v58 }
 0x1b2   : > { %v1514_v19 = vmul.f32 %v4262_v16, %v3494_v58  ;;  %v2247_v5 = vmin.f32 %v2215_v27, 6.0  ;;  %v1945_v33 = vadd.f32 %v1913_v14, %v1844_v24  ;;  %v1445_v31 = vadd.f32 %v1413_v63, %v1313_v15  ;;  %v1880_v16 = vld [vmem:[#allocation2 + $0x188] sm:$0xff] }
 0x1b3   : > { %v1446_v36 = vadd.f32 %v1414_v30, %v1314_v21  ;;  %v1946_v25 = vadd.f32 %v1914_v26, %v1845_v2  ;;  %v1614_v18 = vmul.f32 %v4292_v35, %v3504_v6  ;;  %v1615_v60 = vmul.f32 %v4294_v7, %v3504_v6 }
 0x1b4   : > { %v1714_v11 = vmul.f32 %v4300_v56, %v3524_v39  ;;  %v2266_v43 = vpack.c.bf16 %v2247_v5, %v2246_v13  ;;  %v2045_v50 = vadd.f32 %v2013_v20, %v1945_v33  ;;  %v1545_v28 = vadd.f32 %v1513_v9, %v1445_v31 }
 0x1b5   : > { %v1546_v37 = vadd.f32 %v1514_v19, %v1446_v36  ;;  %v2046_v10 = vadd.f32 %v2014_v53, %v1946_v25  ;;  %v1715_v55 = vmul.f32 %v4302_v32, %v3524_v39  ;;  %v1814_v54 = vmul.f32 %v4309_v0, %v3527_v40 }
 0x1b6   : > { %v1815_v34 = vmul.f32 %v4311_v38, %v3527_v40  ;;  %3163 = vmatprep.mubr.msk.bf16.mxu1 %vm1192_vm3, %v2266_v43  ;;  %v2145_v41 = vadd.f32 %v2113_v17, %v2045_v50  ;;  %v1646_v46 = vadd.f32 %v1614_v18, %v1545_v28  ;;  %v1915_v62 = vmul.f32 %v3533_v48, %v1879_v57  ;;  %v1882_v50 = vld [vmem:[#allocation2 + $0x1a0] sm:$0xff] }
 0x1b7   : > { %v1647_v47 = vadd.f32 %v1615_v60, %v1546_v37  ;;  %v2146_v14 = vadd.f32 %v2114_v59, %v2046_v10  ;;  %v1916_v26 = vmul.f32 %v3533_v48, %v1880_v16  ;;  %v2015_v29 = vmul.f32 %v3536_v49, %v1979_v51  ;;  %v1981_v28 = vld [vmem:[#allocation2 + $0x199] sm:$0xff] }
 0x1b8   : > { %v2016_v12 = vmul.f32 %v3536_v49, %v1980_v42  ;;  %v2184_v20 = vadd.f32 %v4102_v1, %v2145_v41  ;;  %v1746_v53 = vadd.f32 %v1714_v11, %v1646_v46  ;;  %v2115_v22 = vmul.f32 %v3994_v8, %v2079_v61 }
 0x1b9   : > { %v1747_v3 = vadd.f32 %v1715_v55, %v1647_v47  ;;  %v2185_v17 = vadd.f32 %v4102_v1, %v2146_v14  ;;  %v2116_v23 = vmul.f32 %v3994_v8, %v2080_v4  ;;  %v1315_v52 = vmul.f32 %v4292_v35, %v3480_v44  ;;  %v2082_v47 = vld [vmem:[#allocation2 + $0x1a2] sm:$0xff] }
 0x1ba   : > { %v1316_v59 = vmul.f32 %v4294_v7, %v3480_v44  ;;  %v2216_v15 = vmax.f32 %v2184_v20, 0.0  ;;  %v1846_v21 = vadd.f32 %v1814_v54, %v1746_v53  ;;  %v1415_v24 = vmul.f32 %v4300_v56, %v3483_v45  ;;  %v2081_v54 = vld [vmem:[#allocation2 + $0x19a] sm:$0xff] }
 0x1bb   : > { %v1847_v27 = vadd.f32 %v1815_v34, %v1747_v3  ;;  %v2217_v63 = vmax.f32 %v2185_v17, 0.0  ;;  %v1416_v30 = vmul.f32 %v4302_v32, %v3483_v45  ;;  %v1515_v13 = vmul.f32 %v4309_v0, %v3494_v58 }
 0x1bc   : > { %v1516_v2 = vmul.f32 %v4311_v38, %v3494_v58  ;;  %v2248_v35 = vmin.f32 %v2216_v15, 6.0  ;;  %v1947_v9 = vadd.f32 %v1915_v62, %v1846_v21  ;;  %v1447_v44 = vadd.f32 %v1415_v24, %v1315_v52  ;;  %v1881_v58 = vld [vmem:[#allocation2 + $0x198] sm:$0xff] }
 0x1bd   : > { %v1948_v19 = vadd.f32 %v1916_v26, %v1847_v27  ;;  %v2249_v7 = vmin.f32 %v2217_v63, 6.0  ;;  %v1448_v5 = vadd.f32 %v1416_v30, %v1316_v59  ;;  %v1616_v33 = vmul.f32 %v1879_v57, %v3504_v6  ;;  %v2931_v27 = vld [vmem:[%s3311_s10 + $0x30] sm:$0xff]  ;;  %v2932_v24 = vld [vmem:[%s3311_s10 + $0x38] sm:$0xff]  ;;  %v2929_v30 = vld [vmem:[%s3311_s10 + $0x20] sm:$0xff] }
 0x1be   : > { %v1617_v56 = vmul.f32 %v1880_v16, %v3504_v6  ;;  %v2047_v31 = vadd.f32 %v2015_v29, %v1947_v9  ;;  %v1547_v25 = vadd.f32 %v1515_v13, %v1447_v44  ;;  %v1716_v45 = vmul.f32 %v1979_v51, %v3524_v39  ;;  %v2928_v63 = vld [vmem:[%s3311_s10 + $0x18] sm:$0xff]  ;;  %v2933_v13 = vld [vmem:[%s3311_s10 + $0x40] sm:$0xff]  ;;  %v2930_v9 = vld [vmem:[%s3311_s10 + $0x28] sm:$0xff] }
 0x1bf   : > { %v2048_v36 = vadd.f32 %v2016_v12, %v1948_v19  ;;  %v2267_v32 = vpack.c.bf16 %v2249_v7, %v2248_v35  ;;  %v1548_v0 = vadd.f32 %v1516_v2, %v1448_v5  ;;  %v1717_v18 = vmul.f32 %v1980_v42, %v3524_v39  ;;  %v1982_v42 = vld [vmem:[#allocation2 + $0x1a1] sm:$0xff] }
 0x1c0   : > { %v2147_v38 = vadd.f32 %v2115_v22, %v2047_v31  ;;  %v1648_v11 = vadd.f32 %v1616_v33, %v1547_v25  ;;  %v1816_v43 = vmul.f32 %v2079_v61, %v3527_v40  ;;  %v1817_v6 = vmul.f32 %v2080_v4, %v3527_v40 }
 0x1c1   : > { %v2148_v60 = vadd.f32 %v2116_v23, %v2048_v36  ;;  %3164 = vmatmul.mubr.msk.bf16.gmra.mrb[60].mxu1 %vm1192_vm3, %v2267_v32  ;;  %v1649_v57 = vadd.f32 %v1617_v56, %v1548_v0  ;;  %v1917_v39 = vmul.f32 %v3533_v48, %v1881_v58  ;;  %v1918_v55 = vmul.f32 %v3533_v48, %v1882_v50 }
 0x1c2   : > { %v2186_v37 = vadd.f32 %v4102_v1, %v2147_v38  ;;  %v1748_v51 = vadd.f32 %v1716_v45, %v1648_v11  ;;  %v2017_v46 = vmul.f32 %v3536_v49, %v1981_v28  ;;  %v2018_v62 = vmul.f32 %v3536_v49, %v1982_v42  ;;  %v2938_v28 = vld [vmem:[%s3311_s10 + $0x68] sm:$0xff] }
 0x1c3   : > { %v2187_v16 = vadd.f32 %v4102_v1, %v2148_v60  ;;  %v1749_v10 = vadd.f32 %v1717_v18, %v1649_v57  ;;  %v2117_v29 = vmul.f32 %v3994_v8, %v2081_v54  ;;  %v2118_v20 = vmul.f32 %v3994_v8, %v2082_v47 }
 0x1c4   : > { %v2218_v34 = vmax.f32 %v2186_v37, 0.0  ;;  %v1848_v41 = vadd.f32 %v1816_v43, %v1748_v51  ;;  %v2607_v2 = vrot.slane %v2931_v27, 1  ;;  %v2608_v35 = vrot.slane %v2932_v24, 1  ;;  %v2934_v37 = vld [vmem:[%s3311_s10 + $0x48] sm:$0xff]  ;;  %v2939_v51 = vld [vmem:[%s3311_s10 + $0x70] sm:$0xff] }
 0x1c5   : > { %v2219_v61 = vmax.f32 %v2187_v16, 0.0  ;;  %v1849_v40 = vadd.f32 %v1817_v6, %v1749_v10  ;;  %v2602_v19 = vrot.slane %v2928_v63, 1  ;;  %v2603_v44 = vrot.slane %v2929_v30, 1  ;;  %v2937_v6 = vld [vmem:[%s3311_s10 + $0x60] sm:$0xff]  ;;  %v2935_v16 = vld [vmem:[%s3311_s10 + $0x50] sm:$0xff]  ;;  %v2936_v10 = vld [vmem:[%s3311_s10 + $0x58] sm:$0xff] }
 0x1c6   : > { %v2250_v4 = vmin.f32 %v2218_v34, 6.0  ;;  %v1949_v26 = vadd.f32 %v1917_v39, %v1848_v41  ;;  %v2610_v7 = vrot.slane %v2933_v13, 1  ;;  %v2605_v5 = vrot.slane %v2930_v9, 1  ;;  %v2942_v27 = vld [vmem:[%s3311_s10 + $0x88] sm:$0xff] }
 0x1c7   : > { %v2251_v14 = vmin.f32 %v2219_v61, 6.0  ;;  %v1950_v12 = vadd.f32 %v1918_v55, %v1849_v40  ;;  %v2609_v56 = vsel %vm2601_vm7, %v2607_v2, %v2608_v35  ;;  %v2604_v25 = vsel %vm2601_vm7, %v2602_v19, %v2603_v44 }
 0x1c8   : > { %v2049_v53 = vadd.f32 %v2017_v46, %v1949_v26  ;;  %v2611_v0 = vsel %vm2601_vm7, %v2608_v35, %v2610_v7  ;;  %v2606_v60 = vsel %vm2601_vm7, %v2603_v44, %v2605_v5  ;;  %v2617_v39 = vrot.slane %v2937_v6, 1  ;;  %v2948_v6 = vld [vmem:[%s3311_s10 + $0xb8] sm:$0xff] }
 0x1c9   : > { %v2268_v48 = vpack.c.bf16 %v2251_v14, %v2250_v4  ;;  %v2050_v3 = vadd.f32 %v2018_v62, %v1950_v12  ;;  %v2618_v42 = vrot.slane %v2938_v28, 1  ;;  %v2612_v55 = vrot.slane %v2934_v37, 1 }
 0x1ca   : > { %v2149_v22 = vadd.f32 %v2117_v29, %v2049_v53  ;;  %v2613_v54 = vrot.slane %v2935_v16, 1  ;;  %v2620_v34 = vrot.slane %v2939_v51, 1  ;;  %v2615_v61 = vrot.slane %v2936_v10, 1 }
 0x1cb   : > { %3167 = vmatprep.mubr.msk.bf16.mxu1 %vm1192_vm3, %v2268_v48  ;;  %v2150_v49 = vadd.f32 %v2118_v20, %v2050_v3  ;;  %v2619_v46 = vsel %vm2601_vm7, %v2617_v39, %v2618_v42  ;;  %v2625_v13 = vrot.slane %v2942_v27, 1  ;;  %v2635_v51 = vrot.slane %v2948_v6, 1 }
 0x1cc   : > { %v2188_v17 = vadd.f32 %v4102_v1, %v2149_v22  ;;  %v2614_v62 = vsel %vm2601_vm7, %v2612_v55, %v2613_v54  ;;  %v2621_v26 = vsel %vm2601_vm7, %v2618_v42, %v2620_v34  ;;  %v2616_v48 = vsel %vm2601_vm7, %v2613_v54, %v2615_v61 }
 0x1cd   : > { %v2189_v23 = vadd.f32 %v4102_v1, %v2150_v49  ;;  %v4400_v1 = vld [vmem:[%s4593_s6] ss:$0 sm:$0xff] }
 0x1ce   : > { %v2220_v52 = vmax.f32 %v2188_v17, 0.0  ;;  %v2943_v17 = vld [vmem:[%s3311_s10 + $0x90] sm:$0xff] }
 0x1cf   : > { %v2221_v59 = vmax.f32 %v2189_v23, 0.0  ;;  %v2944_v23 = vld [vmem:[%s3311_s10 + $0x98] sm:$0xff] }
 0x1d0   : > { %v2252_v15 = vmin.f32 %v2220_v52, 6.0  ;;  %v2940_v52 = vld [vmem:[%s3311_s10 + $0x78] sm:$0xff] }
 0x1d1   : > { %v2253_v8 = vmin.f32 %v2221_v59, 6.0  ;;  %v2941_v59 = vld [vmem:[%s3311_s10 + $0x80] sm:$0xff]  ;;  %v2622_v24 = vrot.slane %v2940_v52, 1 }
 0x1d2   : > { %v2623_v63 = vrot.slane %v2941_v59, 1 }
 0x1d3   : > { %v2269_v21 = vpack.c.bf16 %v2253_v8, %v2252_v15  ;;  %v2945_v15 = vld [vmem:[%s3311_s10 + $0xa0] sm:$0xff]  ;;  %v2627_v8 = vrot.slane %v2943_v17, 1  ;;  %v2954_v17 = vld [vmem:[%s3311_s10 + $0xe8] sm:$0xff] }
 0x1d4   : > { %v2630_v30 = vrot.slane %v2945_v15, 1  ;;  %v2624_v44 = vsel %vm2601_vm7, %v2622_v24, %v2623_v63  ;;  %v2645_v15 = vrot.slane %v2954_v17, 1 }
 0x1d5   : > { %3168 = vmatmul.mubr.msk.bf16.gmra.mrb[64].mxu1 %vm1192_vm3, %v2269_v21  ;;  %v2628_v21 = vrot.slane %v2944_v23, 1 }
 0x1d7   : > { %v2629_v35 = vsel %vm2601_vm7, %v2627_v8, %v2628_v21 }
 0x203   : > { %v3141_v33 = vpop.f32.mrb[36].mxu1 }
 0x204   : > { %v2384_v31 = vadd.f32 %v3141_v33, %v4400_v1  ;;  %v2375_v36 = vpop.f32.mrb[37].mxu1  ;;  %v2631_v33 = vsel %vm2601_vm7, %v2628_v21, %v2630_v30 }
 0x205   : > { %v2376_v45 = vadd.f32 %v4400_v1, %v2375_v36  ;;  %v3142_v32 = vpop.f32.mrb[38].mxu1 }
 0x206   : > { %v2716_v18 = vadd.f32 %v2609_v56, %v2384_v31  ;;  %v2387_v58 = vadd.f32 %v3142_v32, %v4400_v1  ;;  %v2378_v38 = vpop.f32.mrb[39].mxu1 }
 0x207   : > { %v2714_v11 = vadd.f32 %v2604_v25, %v2376_v45  ;;  %v2379_v43 = vadd.f32 %v4400_v1, %v2378_v38  ;;  %v2626_v25 = vsel %vm2601_vm7, %v2623_v63, %v2625_v13  ;;  %v2950_v38 = vld [vmem:[%s3311_s10 + $0xc8] sm:$0xff] }
 0x208   : > { %2748 = vst.msk [vmem:[%s4409_s16 + $0x10] sm:$0xff] %vm397_vm2, %v2716_v18  ;;  %v2717_v50 = vadd.f32 %v2611_v0, %v2387_v58  ;;  %v2949_v58 = vld [vmem:[%s3311_s10 + $0xc0] sm:$0xff] }
 0x209   : > { %2746 = vst.msk [vmem:[%s4409_s16] sm:$0xff] %vm397_vm2, %v2714_v11  ;;  %v2715_v57 = vadd.f32 %v2606_v60, %v2379_v43  ;;  %v2946_v60 = vld [vmem:[%s3311_s10 + $0xa8] sm:$0xff]  ;;  %v2947_v11 = vld [vmem:[%s3311_s10 + $0xb0] sm:$0xff] }
 0x20a   : > { %2749 = vst.msk [vmem:[%s4409_s16 + $0x18] sm:$0xff] %vm397_vm2, %v2717_v50  ;;  %v2951_v43 = vld [vmem:[%s3311_s10 + $0xd0] sm:$0xff]  ;;  %v2637_v50 = vrot.slane %v2949_v58, 1  ;;  %v2632_v28 = vrot.slane %v2946_v60, 1  ;;  %v2633_v37 = vrot.slane %v2947_v11, 1  ;;  %v2960_v58 = vld [vmem:[%s3311_s10 + $0x118] sm:$0xff] }
 0x20b   : > { %2747 = vst.msk [vmem:[%s4409_s16 + $0x8] sm:$0xff] %vm397_vm2, %v2715_v57  ;;  %v2638_v57 = vrot.slane %v2950_v38, 1  ;;  %v2640_v16 = vrot.slane %v2951_v43, 1  ;;  %v2655_v43 = vrot.slane %v2960_v58, 1 }
 0x20c   : > { %v2634_v54 = vsel %vm2601_vm7, %v2632_v28, %v2633_v37 }
 0x20d   : > { %v2639_v42 = vsel %vm2601_vm7, %v2637_v50, %v2638_v57 }
 0x21b   : > { %v3145_v41 = vpop.f32.mrb[40].mxu1 }
 0x21c   : > { %v2400_v47 = vadd.f32 %v3145_v41, %v4400_v1  ;;  %v2391_v40 = vpop.f32.mrb[41].mxu1  ;;  %v2641_v41 = vsel %vm2601_vm7, %v2638_v57, %v2640_v16 }
 0x21d   : > { %v2392_v4 = vadd.f32 %v4400_v1, %v2391_v40  ;;  %v3146_v14 = vpop.f32.mrb[42].mxu1 }
 0x21e   : > { %v2720_v29 = vadd.f32 %v2619_v46, %v2400_v47  ;;  %v2403_v12 = vadd.f32 %v3146_v14, %v4400_v1  ;;  %v2394_v20 = vpop.f32.mrb[43].mxu1 }
 0x21f   : > { %v2718_v53 = vadd.f32 %v2614_v62, %v2392_v4  ;;  %v2395_v3 = vadd.f32 %v4400_v1, %v2394_v20  ;;  %v2636_v62 = vsel %vm2601_vm7, %v2633_v37, %v2635_v51  ;;  %v2956_v20 = vld [vmem:[%s3311_s10 + $0xf8] sm:$0xff] }
 0x220   : > { %2752 = vst.msk [vmem:[%s4409_s16 + $0x30] sm:$0xff] %vm397_vm2, %v2720_v29  ;;  %v2721_v22 = vadd.f32 %v2621_v26, %v2403_v12  ;;  %v2955_v12 = vld [vmem:[%s3311_s10 + $0xf0] sm:$0xff] }
 0x221   : > { %2750 = vst.msk [vmem:[%s4409_s16 + $0x20] sm:$0xff] %vm397_vm2, %v2718_v53  ;;  %v2719_v49 = vadd.f32 %v2616_v48, %v2395_v3  ;;  %v2952_v48 = vld [vmem:[%s3311_s10 + $0xd8] sm:$0xff]  ;;  %v2953_v53 = vld [vmem:[%s3311_s10 + $0xe0] sm:$0xff] }
 0x222   : > { %2753 = vst.msk [vmem:[%s4409_s16 + $0x38] sm:$0xff] %vm397_vm2, %v2721_v22  ;;  %v2957_v3 = vld [vmem:[%s3311_s10 + $0x100] sm:$0xff]  ;;  %v2647_v22 = vrot.slane %v2955_v12, 1  ;;  %v2642_v23 = vrot.slane %v2952_v48, 1  ;;  %v2643_v52 = vrot.slane %v2953_v53, 1  ;;  %v2966_v12 = vld [vmem:[%s3311_s10 + $0x148] sm:$0xff] }
 0x223   : > { %2751 = vst.msk [vmem:[%s4409_s16 + $0x28] sm:$0xff] %vm397_vm2, %v2719_v49  ;;  %v2648_v49 = vrot.slane %v2956_v20, 1  ;;  %v2650_v59 = vrot.slane %v2957_v3, 1  ;;  %v2665_v3 = vrot.slane %v2966_v12, 1 }
 0x224   : > { %v2644_v63 = vsel %vm2601_vm7, %v2642_v23, %v2643_v52 }
 0x225   : > { %v2649_v21 = vsel %vm2601_vm7, %v2647_v22, %v2648_v49 }
 0x237   : > { %v3149_v2 = vpop.f32.mrb[44].mxu1 }
 0x238   : > { %v2416_v9 = vadd.f32 %v3149_v2, %v4400_v1  ;;  %v2407_v19 = vpop.f32.mrb[45].mxu1  ;;  %v2651_v2 = vsel %vm2601_vm7, %v2648_v49, %v2650_v59 }
 0x239   : > { %v2408_v7 = vadd.f32 %v4400_v1, %v2407_v19  ;;  %v3150_v5 = vpop.f32.mrb[46].mxu1 }
 0x23a   : > { %v2724_v56 = vadd.f32 %v2629_v35, %v2416_v9  ;;  %v2419_v31 = vadd.f32 %v3150_v5, %v4400_v1  ;;  %v2410_v36 = vpop.f32.mrb[47].mxu1 }
 0x23b   : > { %v2722_v45 = vadd.f32 %v2624_v44, %v2408_v7  ;;  %v2411_v32 = vadd.f32 %v4400_v1, %v2410_v36  ;;  %v2646_v44 = vsel %vm2601_vm7, %v2643_v52, %v2645_v15  ;;  %v2962_v36 = vld [vmem:[%s3311_s10 + $0x128] sm:$0xff] }
 0x23c   : > { %2756 = vst.msk [vmem:[%s4409_s16 + $0x50] sm:$0xff] %vm397_vm2, %v2724_v56  ;;  %v2725_v0 = vadd.f32 %v2631_v33, %v2419_v31  ;;  %v2961_v31 = vld [vmem:[%s3311_s10 + $0x120] sm:$0xff] }
 0x23d   : > { %2754 = vst.msk [vmem:[%s4409_s16 + $0x40] sm:$0xff] %vm397_vm2, %v2722_v45  ;;  %v2723_v18 = vadd.f32 %v2626_v25, %v2411_v32  ;;  %v2958_v25 = vld [vmem:[%s3311_s10 + $0x108] sm:$0xff]  ;;  %v2959_v45 = vld [vmem:[%s3311_s10 + $0x110] sm:$0xff] }
 0x23e   : > { %2757 = vst.msk [vmem:[%s4409_s16 + $0x58] sm:$0xff] %vm397_vm2, %v2725_v0  ;;  %v2963_v32 = vld [vmem:[%s3311_s10 + $0x130] sm:$0xff]  ;;  %v2657_v0 = vrot.slane %v2961_v31, 1  ;;  %v2652_v38 = vrot.slane %v2958_v25, 1  ;;  %v2653_v60 = vrot.slane %v2959_v45, 1  ;;  %v2972_v31 = vld [vmem:[%s3311_s10 + $0x178] sm:$0xff] }
 0x23f   : > { %2755 = vst.msk [vmem:[%s4409_s16 + $0x48] sm:$0xff] %vm397_vm2, %v2723_v18  ;;  %v2658_v18 = vrot.slane %v2962_v36, 1  ;;  %v2660_v11 = vrot.slane %v2963_v32, 1  ;;  %v2675_v32 = vrot.slane %v2972_v31, 1 }
 0x240   : > { %v2654_v37 = vsel %vm2601_vm7, %v2652_v38, %v2653_v60 }
 0x241   : > { %v2659_v57 = vsel %vm2601_vm7, %v2657_v0, %v2658_v18 }
 0x257   : > { %v3153_v39 = vpop.f32.mrb[48].mxu1 }
 0x258   : > { %v2432_v10 = vadd.f32 %v3153_v39, %v4400_v1  ;;  %v2423_v55 = vpop.f32.mrb[49].mxu1  ;;  %v2661_v39 = vsel %vm2601_vm7, %v2658_v18, %v2660_v11 }
 0x259   : > { %v2424_v34 = vadd.f32 %v4400_v1, %v2423_v55  ;;  %v3154_v61 = vpop.f32.mrb[50].mxu1 }
 0x25a   : > { %v2728_v46 = vadd.f32 %v2639_v42, %v2432_v10  ;;  %v2435_v47 = vadd.f32 %v3154_v61, %v4400_v1  ;;  %v2426_v40 = vpop.f32.mrb[51].mxu1 }
 0x25b   : > { %v2726_v4 = vadd.f32 %v2634_v54, %v2424_v34  ;;  %v2427_v14 = vadd.f32 %v4400_v1, %v2426_v40  ;;  %v2656_v54 = vsel %vm2601_vm7, %v2653_v60, %v2655_v43  ;;  %v2968_v40 = vld [vmem:[%s3311_s10 + $0x158] sm:$0xff] }
 0x25c   : > { %2760 = vst.msk [vmem:[%s4409_s16 + $0x70] sm:$0xff] %vm397_vm2, %v2728_v46  ;;  %v2729_v26 = vadd.f32 %v2641_v41, %v2435_v47  ;;  %v2967_v47 = vld [vmem:[%s3311_s10 + $0x150] sm:$0xff] }
 0x25d   : > { %2758 = vst.msk [vmem:[%s4409_s16 + $0x60] sm:$0xff] %vm397_vm2, %v2726_v4  ;;  %v2727_v29 = vadd.f32 %v2636_v62, %v2427_v14  ;;  %v2964_v62 = vld [vmem:[%s3311_s10 + $0x138] sm:$0xff]  ;;  %v2965_v4 = vld [vmem:[%s3311_s10 + $0x140] sm:$0xff] }
 0x25e   : > { %2761 = vst.msk [vmem:[%s4409_s16 + $0x78] sm:$0xff] %vm397_vm2, %v2729_v26  ;;  %v2969_v14 = vld [vmem:[%s3311_s10 + $0x160] sm:$0xff]  ;;  %v2667_v26 = vrot.slane %v2967_v47, 1  ;;  %v2662_v20 = vrot.slane %v2964_v62, 1  ;;  %v2663_v48 = vrot.slane %v2965_v4, 1 }
 0x25f   : > { %2759 = vst.msk [vmem:[%s4409_s16 + $0x68] sm:$0xff] %vm397_vm2, %v2727_v29  ;;  %v2668_v29 = vrot.slane %v2968_v40, 1  ;;  %v2670_v53 = vrot.slane %v2969_v14, 1 }
 0x260   : > { %v2664_v52 = vsel %vm2601_vm7, %v2662_v20, %v2663_v48 }
 0x261   : > { %v2669_v49 = vsel %vm2601_vm7, %v2667_v26, %v2668_v29 }
 0x26d   : > { %v3157_v8 = vpop.f32.mrb[52].mxu1 }
 0x26e   : > { %v2448_v27 = vadd.f32 %v3157_v8, %v4400_v1  ;;  %v2439_v24 = vpop.f32.mrb[53].mxu1  ;;  %v2671_v8 = vsel %vm2601_vm7, %v2668_v29, %v2670_v53 }
 0x26f   : > { %v2440_v30 = vadd.f32 %v4400_v1, %v2439_v24  ;;  %v3158_v13 = vpop.f32.mrb[54].mxu1 }
 0x270   : > { %v2732_v35 = vadd.f32 %v2649_v21, %v2448_v27  ;;  %v2451_v9 = vadd.f32 %v3158_v13, %v4400_v1  ;;  %v2442_v19 = vpop.f32.mrb[55].mxu1 }
 0x271   : > { %v2730_v7 = vadd.f32 %v2644_v63, %v2440_v30  ;;  %v2443_v5 = vadd.f32 %v4400_v1, %v2442_v19  ;;  %v2666_v63 = vsel %vm2601_vm7, %v2663_v48, %v2665_v3  ;;  %v2974_v19 = vld [vmem:[%s3311_s10 + $0x188] sm:$0xff] }
 0x272   : > { %2764 = vst.msk [vmem:[%s4409_s16 + $0x90] sm:$0xff] %vm397_vm2, %v2732_v35  ;;  %v2733_v33 = vadd.f32 %v2651_v2, %v2451_v9  ;;  %v2973_v9 = vld [vmem:[%s3311_s10 + $0x180] sm:$0xff] }
 0x273   : > { %2762 = vst.msk [vmem:[%s4409_s16 + $0x80] sm:$0xff] %vm397_vm2, %v2730_v7  ;;  %v2731_v56 = vadd.f32 %v2646_v44, %v2443_v5  ;;  %v2970_v44 = vld [vmem:[%s3311_s10 + $0x168] sm:$0xff]  ;;  %v2971_v7 = vld [vmem:[%s3311_s10 + $0x170] sm:$0xff] }
 0x274   : > { %2765 = vst.msk [vmem:[%s4409_s16 + $0x98] sm:$0xff] %vm397_vm2, %v2733_v33  ;;  %v2975_v5 = vld [vmem:[%s3311_s10 + $0x190] sm:$0xff]  ;;  %v2677_v33 = vrot.slane %v2973_v9, 1  ;;  %v2672_v36 = vrot.slane %v2970_v44, 1  ;;  %v2673_v25 = vrot.slane %v2971_v7, 1 }
 0x275   : > { %2763 = vst.msk [vmem:[%s4409_s16 + $0x88] sm:$0xff] %vm397_vm2, %v2731_v56  ;;  %v2678_v56 = vrot.slane %v2974_v19, 1  ;;  %v2680_v45 = vrot.slane %v2975_v5, 1 }
 0x276   : > { %v2674_v60 = vsel %vm2601_vm7, %v2672_v36, %v2673_v25 }
 0x277   : > { %v2679_v18 = vsel %vm2601_vm7, %v2677_v33, %v2678_v56 }
 0x27f   : > { %v3161_v50 = vpop.f32.mrb[56].mxu1 }
 0x280   : > { %v2464_v6 = vadd.f32 %v3161_v50, %v4400_v1  ;;  %v2455_v28 = vpop.f32.mrb[57].mxu1  ;;  %v2681_v50 = vsel %vm2601_vm7, %v2678_v56, %v2680_v45 }
 0x281   : > { %v2456_v16 = vadd.f32 %v4400_v1, %v2455_v28  ;;  %v3162_v51 = vpop.f32.mrb[58].mxu1 }
 0x282   : > { %v2736_v42 = vadd.f32 %v2659_v57, %v2464_v6  ;;  %v2467_v10 = vadd.f32 %v3162_v51, %v4400_v1  ;;  %v2458_v55 = vpop.f32.mrb[59].mxu1 }
 0x283   : > { %v2734_v34 = vadd.f32 %v2654_v37, %v2456_v16  ;;  %v2459_v61 = vadd.f32 %v4400_v1, %v2458_v55  ;;  %v2676_v37 = vsel %vm2601_vm7, %v2673_v25, %v2675_v32 }
 0x284   : > { %2768 = vst.msk [vmem:[%s4409_s16 + $0xb0] sm:$0xff] %vm397_vm2, %v2736_v42  ;;  %v2737_v41 = vadd.f32 %v2661_v39, %v2467_v10 }
 0x285   : > { %2766 = vst.msk [vmem:[%s4409_s16 + $0xa0] sm:$0xff] %vm397_vm2, %v2734_v34  ;;  %v2735_v46 = vadd.f32 %v2656_v54, %v2459_v61 }
 0x286   : > { %2769 = vst.msk [vmem:[%s4409_s16 + $0xb8] sm:$0xff] %vm397_vm2, %v2737_v41 }
 0x287   : > { %2767 = vst.msk [vmem:[%s4409_s16 + $0xa8] sm:$0xff] %vm397_vm2, %v2735_v46 }
 0x294   : > { %v3165_v22 = vpop.f32.mrb[60].mxu1 }
 0x295   : > { %v2480_v17 = vadd.f32 %v3165_v22, %v4400_v1  ;;  %v2471_v23 = vpop.f32.mrb[61].mxu1 }
 0x296   : > { %v2472_v59 = vadd.f32 %v4400_v1, %v2471_v23  ;;  %v3166_v15 = vpop.f32.mrb[62].mxu1 }
 0x297   : > { %v2740_v21 = vadd.f32 %v2669_v49, %v2480_v17  ;;  %v2483_v27 = vadd.f32 %v3166_v15, %v4400_v1  ;;  %v2474_v24 = vpop.f32.mrb[63].mxu1 }
 0x298   : > { %v2738_v30 = vadd.f32 %v2664_v52, %v2472_v59  ;;  %v2475_v13 = vadd.f32 %v4400_v1, %v2474_v24 }
 0x299   : > { %2772 = vst.msk [vmem:[%s4409_s16 + $0xd0] sm:$0xff] %vm397_vm2, %v2740_v21  ;;  %v2741_v2 = vadd.f32 %v2671_v8, %v2483_v27 }
 0x29a   : > { %2770 = vst.msk [vmem:[%s4409_s16 + $0xc0] sm:$0xff] %vm397_vm2, %v2738_v30  ;;  %v2739_v35 = vadd.f32 %v2666_v63, %v2475_v13 }
 0x29b   : > { %2773 = vst.msk [vmem:[%s4409_s16 + $0xd8] sm:$0xff] %vm397_vm2, %v2741_v2 }
 0x29c   : > { %2771 = vst.msk [vmem:[%s4409_s16 + $0xc8] sm:$0xff] %vm397_vm2, %v2739_v35 }
 0x2a8   : > { %v3169_v0 = vpop.f32.mrb[64].mxu1 }
 0x2a9   : > { %v2496_v58 = vadd.f32 %v3169_v0, %v4400_v1  ;;  %v2487_v38 = vpop.f32.mrb[65].mxu1 }
 0x2aa   : > { %v2488_v11 = vadd.f32 %v4400_v1, %v2487_v38  ;;  %v3170_v43 = vpop.f32.mrb[66].mxu1 }
 0x2ab   : > { %v2744_v57 = vadd.f32 %v2679_v18, %v2496_v58  ;;  %v2499_v6 = vadd.f32 %v3170_v43, %v4400_v1  ;;  %v2490_v28 = vpop.f32.mrb[67].mxu1 }
 0x2ac   : > { %v2742_v16 = vadd.f32 %v2674_v60, %v2488_v11  ;;  %v2491_v51 = vadd.f32 %v4400_v1, %v2490_v28 }
 0x2ad   : > { %2776 = vst.msk [vmem:[%s4409_s16 + $0xf0] sm:$0xff] %vm397_vm2, %v2744_v57  ;;  %v2745_v39 = vadd.f32 %v2681_v50, %v2499_v6 }
 0x2ae   : > { %2774 = vst.msk [vmem:[%s4409_s16 + $0xe0] sm:$0xff] %vm397_vm2, %v2742_v16  ;;  %v2743_v42 = vadd.f32 %v2676_v37, %v2491_v51 }
 0x2af   : > { %2777 = vst.msk [vmem:[%s4409_s16 + $0xf8] sm:$0xff] %vm397_vm2, %v2745_v39 }
 0x2b0   : > { %2775 = vst.msk [vmem:[%s4409_s16 + $0xe8] sm:$0xff] %vm397_vm2, %v2743_v42 }
 0x2b1 PF: > { %s17_s26 = sadd.s32 1, %s3234_s26   ;;  %s4595_s24 = smov %s3230_s25 }
 0x2b2   : > { %p14_p5 = scmp.ge.s32.totalorder %s17_s26, 4   ;;  %s4596_s25 = smov %s4598_s27 }
 0x2b4   :  { %16 = sbr.rel (!%p14_p5) target bundleno = 2 (0x2), region = 82 }

</bundles_post_ra>
